<compile_context>
chip_gen: v7x
topology: tpu7x:2x2x1
jax: 0.10.0
libtpu: 0.0.40
codegen_flags: <defaults>
</compile_context>

<pallas_src>
import jax
import jax.numpy as jnp
from jax.experimental import pallas as pl
from jax.experimental.pallas import tpu as pltpu


_CHUNK = 256        # width of each transformed branch
_ATTN_PAD = 128     # lane-dense padded width of the 4-way attention head
_SUB = 16           # bf16 sublane packing -> batch tile must be a multiple of 16


def _fusion_kernel(sem_ref, ms_ref, tex_ref, freq_ref,
                   w_sem_ref, b_sem_ref, w_ms_ref, b_ms_ref,
                   w_a1_sm_ref, w_a1_tex_ref, w_a1_freq_ref, b_a1_ref,
                   w_a2_ref, b_a2_ref,
                   w_fuse_sm_ref, w_fuse_tex_ref, b_fuse_tex_ref,
                   w_fuse_freq_ref, b_fuse_freq_ref, b_fuse_ref,
                   out_ref):
    f32 = jnp.float32
    bf16 = jnp.bfloat16

    def mm(x, w):
        # MXU matmul with f32 accumulation.
        return jnp.dot(x, w, preferred_element_type=f32)

    sem = sem_ref[...]                           # (tb, 512) bf16
    ms_sum = jnp.sum(ms_ref[...], axis=0)        # (tb, 512) bf16 (1/N folded into w_ms)
    tex = tex_ref[...]                           # (tb, 128) bf16
    freq_sum = jnp.sum(freq_ref[...], axis=0)    # (tb, 9)  f32  (1/N folded into weights)

    # ---- sem / ms branch transforms (kept explicit: K=512, folding is FLOP-neutral) ----
    sem_t = mm(sem, w_sem_ref[...]) + b_sem_ref[...]     # (tb, 256) f32
    ms_t = mm(ms_sum, w_ms_ref[...]) + b_ms_ref[...]     # (tb, 256) f32
    sem_tb = sem_t.astype(bf16)
    ms_tb = ms_t.astype(bf16)

    # ---- attention MLP (concat-free; tex/freq branches folded into w_a1_*) ----
    # b_a1_ref already contains b_a1 + b_tex@Wa1_tex + b_freq@Wa1_freq.
    h = (b_a1_ref[...]
         + mm(sem_tb, w_a1_sm_ref[0:_CHUNK, :])
         + mm(ms_tb, w_a1_sm_ref[_CHUNK:2 * _CHUNK, :])
         + mm(tex, w_a1_tex_ref[...])
         + mm(freq_sum, w_a1_freq_ref[...]))             # (tb, 256) f32
    h = jnp.maximum(h, 0.0).astype(bf16)

    # logits padded to 128 lanes; padded lanes carry bias -1e30 -> softmax weight 0.
    logits = mm(h, w_a2_ref[...]) + b_a2_ref[...]        # (tb, 128) f32
    logits = logits - jnp.max(logits, axis=1, keepdims=True)
    e = jnp.exp(logits)
    attn = e * pl.reciprocal(jnp.sum(e, axis=1, keepdims=True), approx=True)

    # ---- fusion head ----
    # TODO(synk): the original PyTorch loop `weighted_features += w_i * chunk_i`
    # broadcasts (B,256) into (B,1024), which is a shape bug in the reference;
    # implemented here as per-chunk scaling (the only interpretation consistent
    # with the downstream Linear(1024, feature_dim)).
    # sem/ms: scale the (tb,256) chunk before the fusion matmul; accumulator is
    # seeded directly from b_fuse.  tex/freq: folded K=128 / K=9 matmuls, scaled
    # after (their branch bias row must also be scaled by the attention weight).
    acc = b_fuse_ref[...] + mm((attn[:, 0:1] * sem_t).astype(bf16),
                               w_fuse_sm_ref[0:_CHUNK, :])
    acc = acc + mm((attn[:, 1:2] * ms_t).astype(bf16),
                   w_fuse_sm_ref[_CHUNK:2 * _CHUNK, :])
    acc = acc + attn[:, 2:3] * (mm(tex, w_fuse_tex_ref[...]) + b_fuse_tex_ref[...])
    acc = acc + attn[:, 3:4] * (mm(freq_sum, w_fuse_freq_ref[...]) + b_fuse_freq_ref[...])

    fused = jnp.maximum(acc, 0.0)
    # TODO(synk): Dropout(0.2) is identity here (eval mode); training would need
    # pltpu.prng_seed / pltpu.prng_random_bits-based masking.
    out_ref[...] = fused.astype(out_ref.dtype)


def _round_up(x, m):
    return (x + m - 1) // m * m


def feature_fusion_forward(semantic, multi_scale_stack, texture, freq_stack,
                           params, *, block_batch=256, out_dtype=jnp.bfloat16):
    """Forward pass of FeatureFusionModule as one batch-tiled Pallas kernel."""
    f32, bf16 = jnp.float32, jnp.bfloat16
    B = semantic.shape[0]
    num_ms = multi_scale_stack.shape[0]
    num_fq = freq_stack.shape[0]
    feature_dim = params["w_fuse"].shape[1]
    # TODO(synk): the PyTorch `len(multi_scale_features)==0 -> zeros` branch is
    # not represented; the stacked input assumes at least one multi-scale feature.

    # ---- host-side weight prep -------------------------------------------------
    # Fold the stack means' 1/N into the weights, fold the purely-linear texture
    # and freq branches through the attention-MLP / fusion weights, cast matmul
    # weights to bf16 (f32 accumulation on the MXU).
    w_a1 = params["w_a1"]          # (1024, 256) chunk layout: [sem | ms | tex | freq]
    w_fuse = params["w_fuse"]      # (1024, feature_dim), same chunk layout
    w_freq_m = params["w_freq"] / num_fq

    w_sem = params["w_sem"].astype(bf16)
    b_sem = params["b_sem"].astype(f32)
    w_ms = (params["w_ms"] / num_ms).astype(bf16)
    b_ms = params["b_ms"].astype(f32)

    w_a1_sm = w_a1[0:2 * _CHUNK, :].astype(bf16)                        # (512, 256)
    w_a1_tex = (params["w_tex"] @ w_a1[2 * _CHUNK:3 * _CHUNK, :]).astype(bf16)   # (128, 256)
    # K=9 freq contraction kept f32 (tiny; proven lowering path).
    w_a1_freq = (w_freq_m @ w_a1[3 * _CHUNK:4 * _CHUNK, :]).astype(f32)          # (9, 256)
    b_a1 = (params["b_a1"]
            + params["b_tex"] @ w_a1[2 * _CHUNK:3 * _CHUNK, :]
            + params["b_freq"] @ w_a1[3 * _CHUNK:4 * _CHUNK, :]).astype(f32)     # (1, 256)

    # Pad the 4-wide attention head to a lane-dense 128-wide output.
    n_attn = params["w_a2"].shape[1]
    w_a2 = jnp.zeros((params["w_a2"].shape[0], _ATTN_PAD), bf16)
    w_a2 = w_a2.at[:, :n_attn].set(params["w_a2"].astype(bf16))
    b_a2 = jnp.full((1, _ATTN_PAD), -1e30, f32)
    b_a2 = b_a2.at[:, :n_attn].set(params["b_a2"].astype(f32))

    w_fuse_sm = w_fuse[0:2 * _CHUNK, :].astype(bf16)                             # (512, fd)
    w_fuse_tex = (params["w_tex"] @ w_fuse[2 * _CHUNK:3 * _CHUNK, :]).astype(bf16)   # (128, fd)
    b_fuse_tex = (params["b_tex"] @ w_fuse[2 * _CHUNK:3 * _CHUNK, :]).astype(f32)    # (1, fd)
    w_fuse_freq = (w_freq_m @ w_fuse[3 * _CHUNK:4 * _CHUNK, :]).astype(f32)          # (9, fd)
    b_fuse_freq = (params["b_freq"] @ w_fuse[3 * _CHUNK:4 * _CHUNK, :]).astype(f32)  # (1, fd)
    b_fuse = params["b_fuse"].astype(f32)

    # ---- host-side activation prep: bf16 inputs (freq stays f32, 9 lanes only) --
    semantic = semantic.astype(bf16)
    multi_scale_stack = multi_scale_stack.astype(bf16)
    texture = texture.astype(bf16)
    freq_stack = freq_stack.astype(f32)

    # ---- batch tiling: multiple-of-16 tiles (bf16 sublane packing) --------------
    tb = min(block_batch, _round_up(B, _SUB))
    tb = _round_up(tb, _SUB)
    # v7x has 2 TensorCores; make sure the parallel grid has >= 2 steps when the
    # batch allows, otherwise one core idles.
    if B > _SUB and _round_up(B, tb) == tb:
        tb = _round_up((B + 1) // 2, _SUB)
    Bp = _round_up(B, tb)
    if Bp != B:
        pad = Bp - B
        semantic = jnp.pad(semantic, ((0, pad), (0, 0)))
        multi_scale_stack = jnp.pad(multi_scale_stack, ((0, 0), (0, pad), (0, 0)))
        texture = jnp.pad(texture, ((0, pad), (0, 0)))
        freq_stack = jnp.pad(freq_stack, ((0, 0), (0, pad), (0, 0)))
    grid = (Bp // tb,)

    d_sem = semantic.shape[1]
    d_ms = multi_scale_stack.shape[2]
    d_tex = texture.shape[1]
    d_fq = freq_stack.shape[2]

    def batched2(d):
        return pl.BlockSpec((tb, d), lambda i: (i, 0))

    def stacked3(n, d):
        return pl.BlockSpec((n, tb, d), lambda i: (0, i, 0))

    def resident(arr):
        nd = arr.ndim
        return pl.BlockSpec(arr.shape, lambda i: (0,) * nd)

    weight_args = (w_sem, b_sem, w_ms, b_ms,
                   w_a1_sm, w_a1_tex, w_a1_freq, b_a1,
                   w_a2, b_a2,
                   w_fuse_sm, w_fuse_tex, b_fuse_tex,
                   w_fuse_freq, b_fuse_freq, b_fuse)

    in_specs = [
        batched2(d_sem),
        stacked3(num_ms, d_ms),
        batched2(d_tex),
        stacked3(num_fq, d_fq),
    ] + [resident(w) for w in weight_args]
    out_spec = pl.BlockSpec((tb, feature_dim), lambda i: (i, 0))

    out = pl.pallas_call(
        _fusion_kernel,
        out_shape=jax.ShapeDtypeStruct((Bp, feature_dim), out_dtype),
        grid=grid,
        in_specs=in_specs,
        out_specs=out_spec,
        compiler_params=pltpu.CompilerParams(
            dimension_semantics=("parallel",),
            vmem_limit_bytes=32 * 1024 * 1024),
    )(semantic, multi_scale_stack, texture, freq_stack, *weight_args)
    return out[:B]


def init_params(key, feature_dim=256):
    """Deterministic PyTorch-Linear-style init: U(-1/sqrt(fan_in), 1/sqrt(fan_in))."""
    def linear_params(k, fan_in, fan_out):
        k1, k2 = jax.random.split(k)
        bound = 1.0 / (fan_in ** 0.5)
        w = jax.random.uniform(k1, (fan_in, fan_out), jnp.float32, -bound, bound)
        b = jax.random.uniform(k2, (1, fan_out), jnp.float32, -bound, bound)
        return w, b

    keys = jax.random.split(key, 7)
    p = {}
    p["w_sem"], p["b_sem"] = linear_params(keys[0], 512, 256)
    p["w_ms"], p["b_ms"] = linear_params(keys[1], 512, 256)
    p["w_tex"], p["b_tex"] = linear_params(keys[2], 128, 256)
    p["w_freq"], p["b_freq"] = linear_params(keys[3], 9, 256)
    p["w_a1"], p["b_a1"] = linear_params(keys[4], 1024, 256)
    p["w_a2"], p["b_a2"] = linear_params(keys[5], 256, 4)
    p["w_fuse"], p["b_fuse"] = linear_params(keys[6], 1024, feature_dim)
    return p


if __name__ == "__main__":
    key = jax.random.PRNGKey(0)
    k_in, k_p = jax.random.split(key)
    k1, k2, k3, k4 = jax.random.split(k_in, 4)

    B = 32
    semantic = jax.random.normal(k1, (B, 512), jnp.float32)        # semantic_features
    multi_scale = jax.random.normal(k2, (3, B, 512), jnp.float32)  # 3 multi-scale feats (stacked)
    texture = jax.random.normal(k3, (B, 128), jnp.float32)         # texture_contrast_features
    freq = jax.random.normal(k4, (2, B, 9), jnp.float32)           # 2 freq feats (stacked)

    params = init_params(k_p, feature_dim=256)

    # With the default block_batch, the >=2-step cap gives tb=16 and a 2-step
    # parallel grid at B=32 (exercises the grid / both v7x TensorCores).
    out = feature_fusion_forward(semantic, multi_scale, texture, freq, params)
    jax.block_until_ready(out)
    assert out.shape == (B, 256)
    assert bool(jnp.all(jnp.isfinite(out.astype(jnp.float32))))
    print("KERNEL_OK")
</pallas_src>

<mosaic_0001>
module attributes {stable_mosaic.version = 11 : i64} {
  func.func @_fusion_kernel(%arg0: i32, %arg1: memref<16x512xbf16, #tpu.memory_space<vmem>>, %arg2: memref<3x16x512xbf16, #tpu.memory_space<vmem>>, %arg3: memref<16x128xbf16, #tpu.memory_space<vmem>>, %arg4: memref<2x16x9xf32, #tpu.memory_space<vmem>>, %arg5: memref<512x256xbf16, #tpu.memory_space<vmem>>, %arg6: memref<1x256xf32, #tpu.memory_space<vmem>>, %arg7: memref<512x256xbf16, #tpu.memory_space<vmem>>, %arg8: memref<1x256xf32, #tpu.memory_space<vmem>>, %arg9: memref<512x256xbf16, #tpu.memory_space<vmem>>, %arg10: memref<128x256xbf16, #tpu.memory_space<vmem>>, %arg11: memref<9x256xf32, #tpu.memory_space<vmem>>, %arg12: memref<1x256xf32, #tpu.memory_space<vmem>>, %arg13: memref<256x128xbf16, #tpu.memory_space<vmem>>, %arg14: memref<1x128xf32, #tpu.memory_space<vmem>>, %arg15: memref<512x256xbf16, #tpu.memory_space<vmem>>, %arg16: memref<128x256xbf16, #tpu.memory_space<vmem>>, %arg17: memref<1x256xf32, #tpu.memory_space<vmem>>, %arg18: memref<9x256xf32, #tpu.memory_space<vmem>>, %arg19: memref<1x256xf32, #tpu.memory_space<vmem>>, %arg20: memref<1x256xf32, #tpu.memory_space<vmem>>, %arg21: memref<16x256xbf16, #tpu.memory_space<vmem>>) attributes {dimension_semantics = [#tpu.dimension_semantics<parallel>], iteration_bounds = array<i64: 2>, scalar_prefetch = 0 : i64, scratch_operands = 0 : i64, tpu.core_type = #tpu.core_type<tc>, window_params = [{transform_indices = @transform_0, window_bounds = array<i64: 16, 512>}, {transform_indices = @transform_1, window_bounds = array<i64: 3, 16, 512>}, {transform_indices = @transform_2, window_bounds = array<i64: 16, 128>}, {transform_indices = @transform_3, window_bounds = array<i64: 2, 16, 9>}, {pipeline_mode = #tpu.pipeline_mode<synchronous>, transform_indices = @transform_4, window_bounds = array<i64: 512, 256>}, {pipeline_mode = #tpu.pipeline_mode<synchronous>, transform_indices = @transform_5, window_bounds = array<i64: 1, 256>}, {pipeline_mode = #tpu.pipeline_mode<synchronous>, transform_indices = @transform_6, window_bounds = array<i64: 512, 256>}, {pipeline_mode = #tpu.pipeline_mode<synchronous>, transform_indices = @transform_7, window_bounds = array<i64: 1, 256>}, {pipeline_mode = #tpu.pipeline_mode<synchronous>, transform_indices = @transform_8, window_bounds = array<i64: 512, 256>}, {pipeline_mode = #tpu.pipeline_mode<synchronous>, transform_indices = @transform_9, window_bounds = array<i64: 128, 256>}, {pipeline_mode = #tpu.pipeline_mode<synchronous>, transform_indices = @transform_10, window_bounds = array<i64: 9, 256>}, {pipeline_mode = #tpu.pipeline_mode<synchronous>, transform_indices = @transform_11, window_bounds = array<i64: 1, 256>}, {pipeline_mode = #tpu.pipeline_mode<synchronous>, transform_indices = @transform_12, window_bounds = array<i64: 256, 128>}, {pipeline_mode = #tpu.pipeline_mode<synchronous>, transform_indices = @transform_13, window_bounds = array<i64: 1, 128>}, {pipeline_mode = #tpu.pipeline_mode<synchronous>, transform_indices = @transform_14, window_bounds = array<i64: 512, 256>}, {pipeline_mode = #tpu.pipeline_mode<synchronous>, transform_indices = @transform_15, window_bounds = array<i64: 128, 256>}, {pipeline_mode = #tpu.pipeline_mode<synchronous>, transform_indices = @transform_16, window_bounds = array<i64: 1, 256>}, {pipeline_mode = #tpu.pipeline_mode<synchronous>, transform_indices = @transform_17, window_bounds = array<i64: 9, 256>}, {pipeline_mode = #tpu.pipeline_mode<synchronous>, transform_indices = @transform_18, window_bounds = array<i64: 1, 256>}, {pipeline_mode = #tpu.pipeline_mode<synchronous>, transform_indices = @transform_19, window_bounds = array<i64: 1, 256>}, {transform_indices = @transform_20, window_bounds = array<i64: 16, 256>}]} {
    %c0 = arith.constant 0 : index
    %c0_0 = arith.constant 0 : index
    %0 = vector.load %arg1[%c0, %c0_0] : memref<16x512xbf16, #tpu.memory_space<vmem>>, vector<16x512xbf16>
    %c0_1 = arith.constant 0 : index
    %c0_2 = arith.constant 0 : index
    %c0_3 = arith.constant 0 : index
    %1 = vector.load %arg2[%c0_1, %c0_2, %c0_3] : memref<3x16x512xbf16, #tpu.memory_space<vmem>>, vector<3x16x512xbf16>
    %2 = arith.extf %1 : vector<3x16x512xbf16> to vector<3x16x512xf32>
    %cst = arith.constant dense<0.000000e+00> : vector<16x512xf32>
    %3 = vector.multi_reduction <add>, %2, %cst [0] : vector<3x16x512xf32> to vector<16x512xf32>
    %4 = arith.truncf %3 : vector<16x512xf32> to vector<16x512xbf16>
    %c0_4 = arith.constant 0 : index
    %c0_5 = arith.constant 0 : index
    %5 = vector.load %arg3[%c0_4, %c0_5] : memref<16x128xbf16, #tpu.memory_space<vmem>>, vector<16x128xbf16>
    %c0_6 = arith.constant 0 : index
    %c0_7 = arith.constant 0 : index
    %c0_8 = arith.constant 0 : index
    %6 = vector.load %arg4[%c0_6, %c0_7, %c0_8] : memref<2x16x9xf32, #tpu.memory_space<vmem>>, vector<2x16x9xf32>
    %cst_9 = arith.constant dense<0.000000e+00> : vector<16x9xf32>
    %7 = vector.multi_reduction <add>, %6, %cst_9 [0] : vector<2x16x9xf32> to vector<16x9xf32>
    %c0_10 = arith.constant 0 : index
    %c0_11 = arith.constant 0 : index
    %8 = vector.load %arg5[%c0_10, %c0_11] : memref<512x256xbf16, #tpu.memory_space<vmem>>, vector<512x256xbf16>
    %cst_12 = arith.constant dense<0.000000e+00> : vector<16x256xf32>
    %9 = tpu.matmul %0, %8, %cst_12 {dimension_numbers = #tpu.dot_dimension_numbers<[1], [0], [0], [1], [0, 0, 1, 1], [], []>} : vector<16x512xbf16>, vector<512x256xbf16>, vector<16x256xf32> -> vector<16x256xf32>
    %c0_13 = arith.constant 0 : index
    %c0_14 = arith.constant 0 : index
    %10 = vector.load %arg6[%c0_13, %c0_14] : memref<1x256xf32, #tpu.memory_space<vmem>>, vector<1x256xf32>
    %11 = vector.broadcast %10 : vector<1x256xf32> to vector<16x256xf32>
    %12 = arith.addf %9, %11 : vector<16x256xf32>
    %c0_15 = arith.constant 0 : index
    %c0_16 = arith.constant 0 : index
    %13 = vector.load %arg7[%c0_15, %c0_16] : memref<512x256xbf16, #tpu.memory_space<vmem>>, vector<512x256xbf16>
    %cst_17 = arith.constant dense<0.000000e+00> : vector<16x256xf32>
    %14 = tpu.matmul %4, %13, %cst_17 {dimension_numbers = #tpu.dot_dimension_numbers<[1], [0], [0], [1], [0, 0, 1, 1], [], []>} : vector<16x512xbf16>, vector<512x256xbf16>, vector<16x256xf32> -> vector<16x256xf32>
    %c0_18 = arith.constant 0 : index
    %c0_19 = arith.constant 0 : index
    %15 = vector.load %arg8[%c0_18, %c0_19] : memref<1x256xf32, #tpu.memory_space<vmem>>, vector<1x256xf32>
    %16 = vector.broadcast %15 : vector<1x256xf32> to vector<16x256xf32>
    %17 = arith.addf %14, %16 : vector<16x256xf32>
    %18 = arith.truncf %12 : vector<16x256xf32> to vector<16x256xbf16>
    %19 = arith.truncf %17 : vector<16x256xf32> to vector<16x256xbf16>
    %c0_20 = arith.constant 0 : index
    %c0_21 = arith.constant 0 : index
    %20 = vector.load %arg12[%c0_20, %c0_21] : memref<1x256xf32, #tpu.memory_space<vmem>>, vector<1x256xf32>
    %c0_22 = arith.constant 0 : index
    %c0_23 = arith.constant 0 : index
    %21 = vector.load %arg9[%c0_22, %c0_23] : memref<512x256xbf16, #tpu.memory_space<vmem>>, vector<256x256xbf16>
    %cst_24 = arith.constant dense<0.000000e+00> : vector<16x256xf32>
    %22 = tpu.matmul %18, %21, %cst_24 {dimension_numbers = #tpu.dot_dimension_numbers<[1], [0], [0], [1], [0, 0, 1, 1], [], []>} : vector<16x256xbf16>, vector<256x256xbf16>, vector<16x256xf32> -> vector<16x256xf32>
    %23 = vector.broadcast %20 : vector<1x256xf32> to vector<16x256xf32>
    %24 = arith.addf %23, %22 : vector<16x256xf32>
    %c256 = arith.constant 256 : index
    %c0_25 = arith.constant 0 : index
    %25 = vector.load %arg9[%c256, %c0_25] : memref<512x256xbf16, #tpu.memory_space<vmem>>, vector<256x256xbf16>
    %cst_26 = arith.constant dense<0.000000e+00> : vector<16x256xf32>
    %26 = tpu.matmul %19, %25, %cst_26 {dimension_numbers = #tpu.dot_dimension_numbers<[1], [0], [0], [1], [0, 0, 1, 1], [], []>} : vector<16x256xbf16>, vector<256x256xbf16>, vector<16x256xf32> -> vector<16x256xf32>
    %27 = arith.addf %24, %26 : vector<16x256xf32>
    %c0_27 = arith.constant 0 : index
    %c0_28 = arith.constant 0 : index
    %28 = vector.load %arg10[%c0_27, %c0_28] : memref<128x256xbf16, #tpu.memory_space<vmem>>, vector<128x256xbf16>
    %cst_29 = arith.constant dense<0.000000e+00> : vector<16x256xf32>
    %29 = tpu.matmul %5, %28, %cst_29 {dimension_numbers = #tpu.dot_dimension_numbers<[1], [0], [0], [1], [0, 0, 1, 1], [], []>} : vector<16x128xbf16>, vector<128x256xbf16>, vector<16x256xf32> -> vector<16x256xf32>
    %30 = arith.addf %27, %29 : vector<16x256xf32>
    %c0_30 = arith.constant 0 : index
    %c0_31 = arith.constant 0 : index
    %31 = vector.load %arg11[%c0_30, %c0_31] : memref<9x256xf32, #tpu.memory_space<vmem>>, vector<9x256xf32>
    %cst_32 = arith.constant dense<0.000000e+00> : vector<16x256xf32>
    %32 = tpu.matmul %7, %31, %cst_32 {dimension_numbers = #tpu.dot_dimension_numbers<[1], [0], [0], [1], [0, 0, 1, 1], [], []>} : vector<16x9xf32>, vector<9x256xf32>, vector<16x256xf32> -> vector<16x256xf32>
    %33 = arith.addf %30, %32 : vector<16x256xf32>
    %cst_33 = arith.constant 0.000000e+00 : f32
    %34 = vector.broadcast %cst_33 : f32 to vector<16x256xf32>
    %35 = arith.maximumf %33, %34 : vector<16x256xf32>
    %36 = arith.truncf %35 : vector<16x256xf32> to vector<16x256xbf16>
    %c0_34 = arith.constant 0 : index
    %c0_35 = arith.constant 0 : index
    %37 = vector.load %arg13[%c0_34, %c0_35] : memref<256x128xbf16, #tpu.memory_space<vmem>>, vector<256x128xbf16>
    %cst_36 = arith.constant dense<0.000000e+00> : vector<16x128xf32>
    %38 = tpu.matmul %36, %37, %cst_36 {dimension_numbers = #tpu.dot_dimension_numbers<[1], [0], [0], [1], [0, 0, 1, 1], [], []>} : vector<16x256xbf16>, vector<256x128xbf16>, vector<16x128xf32> -> vector<16x128xf32>
    %c0_37 = arith.constant 0 : index
    %c0_38 = arith.constant 0 : index
    %39 = vector.load %arg14[%c0_37, %c0_38] : memref<1x128xf32, #tpu.memory_space<vmem>>, vector<1x128xf32>
    %40 = vector.broadcast %39 : vector<1x128xf32> to vector<16x128xf32>
    %41 = arith.addf %38, %40 : vector<16x128xf32>
    %cst_39 = arith.constant dense<0xFF800000> : vector<16xf32>
    %42 = vector.multi_reduction <maximumf>, %41, %cst_39 [1] : vector<16x128xf32> to vector<16xf32>
    %43 = vector.shape_cast %42 : vector<16xf32> to vector<16x1xf32>
    %44 = vector.broadcast %43 : vector<16x1xf32> to vector<16x128xf32>
    %45 = arith.subf %41, %44 : vector<16x128xf32>
    %46 = math.exp %45 : vector<16x128xf32>
    %cst_40 = arith.constant dense<0.000000e+00> : vector<16xf32>
    %47 = vector.multi_reduction <add>, %46, %cst_40 [1] : vector<16x128xf32> to vector<16xf32>
    %48 = vector.shape_cast %47 : vector<16xf32> to vector<16x1xf32>
    %49 = tpu.reciprocal %48 {approx = true} : vector<16x1xf32> -> vector<16x1xf32>
    %50 = vector.broadcast %49 : vector<16x1xf32> to vector<16x128xf32>
    %51 = arith.mulf %46, %50 : vector<16x128xf32>
    %c0_41 = arith.constant 0 : index
    %c0_42 = arith.constant 0 : index
    %52 = vector.load %arg20[%c0_41, %c0_42] : memref<1x256xf32, #tpu.memory_space<vmem>>, vector<1x256xf32>
    %53 = vector.extract_strided_slice %51 {offsets = [0, 0], sizes = [16, 1], strides = [1, 1]} : vector<16x128xf32> to vector<16x1xf32>
    %54 = vector.broadcast %53 : vector<16x1xf32> to vector<16x256xf32>
    %55 = arith.mulf %54, %12 : vector<16x256xf32>
    %56 = arith.truncf %55 : vector<16x256xf32> to vector<16x256xbf16>
    %c0_43 = arith.constant 0 : index
    %c0_44 = arith.constant 0 : index
    %57 = vector.load %arg15[%c0_43, %c0_44] : memref<512x256xbf16, #tpu.memory_space<vmem>>, vector<256x256xbf16>
    %cst_45 = arith.constant dense<0.000000e+00> : vector<16x256xf32>
    %58 = tpu.matmul %56, %57, %cst_45 {dimension_numbers = #tpu.dot_dimension_numbers<[1], [0], [0], [1], [0, 0, 1, 1], [], []>} : vector<16x256xbf16>, vector<256x256xbf16>, vector<16x256xf32> -> vector<16x256xf32>
    %59 = vector.broadcast %52 : vector<1x256xf32> to vector<16x256xf32>
    %60 = arith.addf %59, %58 : vector<16x256xf32>
    %61 = vector.extract_strided_slice %51 {offsets = [0, 1], sizes = [16, 1], strides = [1, 1]} : vector<16x128xf32> to vector<16x1xf32>
    %62 = vector.broadcast %61 : vector<16x1xf32> to vector<16x256xf32>
    %63 = arith.mulf %62, %17 : vector<16x256xf32>
    %64 = arith.truncf %63 : vector<16x256xf32> to vector<16x256xbf16>
    %c256_46 = arith.constant 256 : index
    %c0_47 = arith.constant 0 : index
    %65 = vector.load %arg15[%c256_46, %c0_47] : memref<512x256xbf16, #tpu.memory_space<vmem>>, vector<256x256xbf16>
    %cst_48 = arith.constant dense<0.000000e+00> : vector<16x256xf32>
    %66 = tpu.matmul %64, %65, %cst_48 {dimension_numbers = #tpu.dot_dimension_numbers<[1], [0], [0], [1], [0, 0, 1, 1], [], []>} : vector<16x256xbf16>, vector<256x256xbf16>, vector<16x256xf32> -> vector<16x256xf32>
    %67 = arith.addf %60, %66 : vector<16x256xf32>
    %68 = vector.extract_strided_slice %51 {offsets = [0, 2], sizes = [16, 1], strides = [1, 1]} : vector<16x128xf32> to vector<16x1xf32>
    %c0_49 = arith.constant 0 : index
    %c0_50 = arith.constant 0 : index
    %69 = vector.load %arg16[%c0_49, %c0_50] : memref<128x256xbf16, #tpu.memory_space<vmem>>, vector<128x256xbf16>
    %cst_51 = arith.constant dense<0.000000e+00> : vector<16x256xf32>
    %70 = tpu.matmul %5, %69, %cst_51 {dimension_numbers = #tpu.dot_dimension_numbers<[1], [0], [0], [1], [0, 0, 1, 1], [], []>} : vector<16x128xbf16>, vector<128x256xbf16>, vector<16x256xf32> -> vector<16x256xf32>
    %c0_52 = arith.constant 0 : index
    %c0_53 = arith.constant 0 : index
    %71 = vector.load %arg17[%c0_52, %c0_53] : memref<1x256xf32, #tpu.memory_space<vmem>>, vector<1x256xf32>
    %72 = vector.broadcast %71 : vector<1x256xf32> to vector<16x256xf32>
    %73 = arith.addf %70, %72 : vector<16x256xf32>
    %74 = vector.broadcast %68 : vector<16x1xf32> to vector<16x256xf32>
    %75 = arith.mulf %74, %73 : vector<16x256xf32>
    %76 = arith.addf %67, %75 : vector<16x256xf32>
    %77 = vector.extract_strided_slice %51 {offsets = [0, 3], sizes = [16, 1], strides = [1, 1]} : vector<16x128xf32> to vector<16x1xf32>
    %c0_54 = arith.constant 0 : index
    %c0_55 = arith.constant 0 : index
    %78 = vector.load %arg18[%c0_54, %c0_55] : memref<9x256xf32, #tpu.memory_space<vmem>>, vector<9x256xf32>
    %cst_56 = arith.constant dense<0.000000e+00> : vector<16x256xf32>
    %79 = tpu.matmul %7, %78, %cst_56 {dimension_numbers = #tpu.dot_dimension_numbers<[1], [0], [0], [1], [0, 0, 1, 1], [], []>} : vector<16x9xf32>, vector<9x256xf32>, vector<16x256xf32> -> vector<16x256xf32>
    %c0_57 = arith.constant 0 : index
    %c0_58 = arith.constant 0 : index
    %80 = vector.load %arg19[%c0_57, %c0_58] : memref<1x256xf32, #tpu.memory_space<vmem>>, vector<1x256xf32>
    %81 = vector.broadcast %80 : vector<1x256xf32> to vector<16x256xf32>
    %82 = arith.addf %79, %81 : vector<16x256xf32>
    %83 = vector.broadcast %77 : vector<16x1xf32> to vector<16x256xf32>
    %84 = arith.mulf %83, %82 : vector<16x256xf32>
    %85 = arith.addf %76, %84 : vector<16x256xf32>
    %cst_59 = arith.constant 0.000000e+00 : f32
    %86 = vector.broadcast %cst_59 : f32 to vector<16x256xf32>
    %87 = arith.maximumf %85, %86 : vector<16x256xf32>
    %88 = arith.truncf %87 : vector<16x256xf32> to vector<16x256xbf16>
    %c0_60 = arith.constant 0 : index
    %c0_61 = arith.constant 0 : index
    %89 = vector.load %arg21[%c0_60, %c0_61] : memref<16x256xbf16, #tpu.memory_space<vmem>>, vector<16x256xbf16>
    tpu.vector_store %arg21[%c0_60, %c0_61], %88 {strides = array<i32>} : memref<16x256xbf16, #tpu.memory_space<vmem>>, vector<16x256xbf16>,
    return
  }
  func.func @transform_0(%arg0: i32) -> (i32, i32) {
    %c0_i32 = arith.constant 0 : i32
    %c0_i32_0 = arith.constant 0 : i32
    return %arg0, %c0_i32 : i32, i32
  }
  func.func @transform_1(%arg0: i32) -> (i32, i32, i32) {
    %c0_i32 = arith.constant 0 : i32
    %c0_i32_0 = arith.constant 0 : i32
    %c0_i32_1 = arith.constant 0 : i32
    return %c0_i32, %arg0, %c0_i32_0 : i32, i32, i32
  }
  func.func @transform_2(%arg0: i32) -> (i32, i32) {
    %c0_i32 = arith.constant 0 : i32
    %c0_i32_0 = arith.constant 0 : i32
    return %arg0, %c0_i32 : i32, i32
  }
  func.func @transform_3(%arg0: i32) -> (i32, i32, i32) {
    %c0_i32 = arith.constant 0 : i32
    %c0_i32_0 = arith.constant 0 : i32
    %c0_i32_1 = arith.constant 0 : i32
    return %c0_i32, %arg0, %c0_i32_0 : i32, i32, i32
  }
  func.func @transform_4(%arg0: i32) -> (i32, i32) {
    %c0_i32 = arith.constant 0 : i32
    %c0_i32_0 = arith.constant 0 : i32
    %c0_i32_1 = arith.constant 0 : i32
    return %c0_i32, %c0_i32_0 : i32, i32
  }
  func.func @transform_5(%arg0: i32) -> (i32, i32) {
    %c0_i32 = arith.constant 0 : i32
    %c0_i32_0 = arith.constant 0 : i32
    %c0_i32_1 = arith.constant 0 : i32
    return %c0_i32, %c0_i32_0 : i32, i32
  }
  func.func @transform_6(%arg0: i32) -> (i32, i32) {
    %c0_i32 = arith.constant 0 : i32
    %c0_i32_0 = arith.constant 0 : i32
    %c0_i32_1 = arith.constant 0 : i32
    return %c0_i32, %c0_i32_0 : i32, i32
  }
  func.func @transform_7(%arg0: i32) -> (i32, i32) {
    %c0_i32 = arith.constant 0 : i32
    %c0_i32_0 = arith.constant 0 : i32
    %c0_i32_1 = arith.constant 0 : i32
    return %c0_i32, %c0_i32_0 : i32, i32
  }
  func.func @transform_8(%arg0: i32) -> (i32, i32) {
    %c0_i32 = arith.constant 0 : i32
    %c0_i32_0 = arith.constant 0 : i32
    %c0_i32_1 = arith.constant 0 : i32
    return %c0_i32, %c0_i32_0 : i32, i32
  }
  func.func @transform_9(%arg0: i32) -> (i32, i32) {
    %c0_i32 = arith.constant 0 : i32
    %c0_i32_0 = arith.constant 0 : i32
    %c0_i32_1 = arith.constant 0 : i32
    return %c0_i32, %c0_i32_0 : i32, i32
  }
  func.func @transform_10(%arg0: i32) -> (i32, i32) {
    %c0_i32 = arith.constant 0 : i32
    %c0_i32_0 = arith.constant 0 : i32
    %c0_i32_1 = arith.constant 0 : i32
    return %c0_i32, %c0_i32_0 : i32, i32
  }
  func.func @transform_11(%arg0: i32) -> (i32, i32) {
    %c0_i32 = arith.constant 0 : i32
    %c0_i32_0 = arith.constant 0 : i32
    %c0_i32_1 = arith.constant 0 : i32
    return %c0_i32, %c0_i32_0 : i32, i32
  }
  func.func @transform_12(%arg0: i32) -> (i32, i32) {
    %c0_i32 = arith.constant 0 : i32
    %c0_i32_0 = arith.constant 0 : i32
    %c0_i32_1 = arith.constant 0 : i32
    return %c0_i32, %c0_i32_0 : i32, i32
  }
  func.func @transform_13(%arg0: i32) -> (i32, i32) {
    %c0_i32 = arith.constant 0 : i32
    %c0_i32_0 = arith.constant 0 : i32
    %c0_i32_1 = arith.constant 0 : i32
    return %c0_i32, %c0_i32_0 : i32, i32
  }
  func.func @transform_14(%arg0: i32) -> (i32, i32) {
    %c0_i32 = arith.constant 0 : i32
    %c0_i32_0 = arith.constant 0 : i32
    %c0_i32_1 = arith.constant 0 : i32
    return %c0_i32, %c0_i32_0 : i32, i32
  }
  func.func @transform_15(%arg0: i32) -> (i32, i32) {
    %c0_i32 = arith.constant 0 : i32
    %c0_i32_0 = arith.constant 0 : i32
    %c0_i32_1 = arith.constant 0 : i32
    return %c0_i32, %c0_i32_0 : i32, i32
  }
  func.func @transform_16(%arg0: i32) -> (i32, i32) {
    %c0_i32 = arith.constant 0 : i32
    %c0_i32_0 = arith.constant 0 : i32
    %c0_i32_1 = arith.constant 0 : i32
    return %c0_i32, %c0_i32_0 : i32, i32
  }
  func.func @transform_17(%arg0: i32) -> (i32, i32) {
    %c0_i32 = arith.constant 0 : i32
    %c0_i32_0 = arith.constant 0 : i32
    %c0_i32_1 = arith.constant 0 : i32
    return %c0_i32, %c0_i32_0 : i32, i32
  }
  func.func @transform_18(%arg0: i32) -> (i32, i32) {
    %c0_i32 = arith.constant 0 : i32
    %c0_i32_0 = arith.constant 0 : i32
    %c0_i32_1 = arith.constant 0 : i32
    return %c0_i32, %c0_i32_0 : i32, i32
  }
  func.func @transform_19(%arg0: i32) -> (i32, i32) {
    %c0_i32 = arith.constant 0 : i32
    %c0_i32_0 = arith.constant 0 : i32
    %c0_i32_1 = arith.constant 0 : i32
    return %c0_i32, %c0_i32_0 : i32, i32
  }
  func.func @transform_20(%arg0: i32) -> (i32, i32) {
    %c0_i32 = arith.constant 0 : i32
    %c0_i32_0 = arith.constant 0 : i32
    return %arg0, %c0_i32 : i32, i32
  }
}

</mosaic_0001>

<bundles_post_ra>
// kernel: tpu_custom_call.1
= control target key start
LH: loop header
LB: loop body
LE: loop exit
PB: predicated region body
PF: predicated region fallthrough
CT: control target
= control target key end

     0   :  { %s6362_s0 = inlined_call_operand.hbm [shape: bf16[32,512], index: 0, kind: input, shape index: {}]   ;;  %s6363_s1 = inlined_call_operand.hbm [shape: bf16[3,32,512], index: 1, kind: input, shape index: {}]   ;;  %s6364_s2 = inlined_call_operand.hbm [shape: bf16[32,128], index: 2, kind: input, shape index: {}]   ;;  %s6365_s3 = inlined_call_operand.vmem [shape: f32[2,32,9], index: 3, kind: input, shape index: {}]   ;;  %s6366_s4 = inlined_call_operand.hbm [shape: bf16[512,256], index: 4, kind: input, shape index: {}]   ;;  %s6367_s5 = inlined_call_operand.vmem [shape: f32[1,256], index: 5, kind: input, shape index: {}]   ;;  %s6368_s6 = inlined_call_operand.hbm [shape: bf16[512,256], index: 6, kind: input, shape index: {}]   ;;  %s6369_s7 = inlined_call_operand.vmem [shape: f32[1,256], index: 7, kind: input, shape index: {}]   ;;  %s6370_s8 = inlined_call_operand.hbm [shape: bf16[512,256], index: 8, kind: input, shape index: {}]   ;;  %s6371_s9 = inlined_call_operand.hbm [shape: bf16[128,256], index: 9, kind: input, shape index: {}]   ;;  %s6372_s10 = inlined_call_operand.hbm [shape: f32[9,256], index: 10, kind: input, shape index: {}]   ;;  %s6373_s11 = inlined_call_operand.vmem [shape: f32[1,256], index: 11, kind: input, shape index: {}]   ;;  %s6374_s12 = inlined_call_operand.hbm [shape: bf16[256,128], index: 12, kind: input, shape index: {}]   ;;  %s6375_s13 = inlined_call_operand.hbm [shape: f32[1,128], index: 13, kind: input, shape index: {}]   ;;  %s6376_s14 = inlined_call_operand.hbm [shape: bf16[512,256], index: 14, kind: input, shape index: {}]   ;;  %s6377_s15 = inlined_call_operand.vmem [shape: bf16[128,256], index: 15, kind: input, shape index: {}]   ;;  %s6378_s16 = inlined_call_operand.vmem [shape: f32[1,256], index: 16, kind: input, shape index: {}]   ;;  %s6379_s17 = inlined_call_operand.hbm [shape: f32[9,256], index: 17, kind: input, shape index: {}]   ;;  %s6380_s18 = inlined_call_operand.vmem [shape: f32[1,256], index: 18, kind: input, shape index: {}]   ;;  %s6381_s19 = inlined_call_operand.vmem [shape: f32[1,256], index: 19, kind: input, shape index: {}]   ;;  %s6382_s20 = inlined_call_operand.hbm [shape: bf16[32,256], index: 20, kind: output, shape index: {}]  }
   0x1   :  { %6407 = sst [smem:[#allocation40_spill]] %s6362_s0 }
   0x2   :  { %6408 = sst [smem:[#allocation41_spill]] %s6363_s1 }
   0x3   :  { %6409 = sst [smem:[#allocation42_spill]] %s6364_s2 }
   0x4   :  { %6410 = sst [smem:[#allocation43_spill]] %s6365_s3 }
   0x5   :  { %6411 = sst [smem:[#allocation44_spill]] %s6366_s4 }
   0x6   :  { %6412 = sst [smem:[#allocation45_spill]] %s6367_s5 }
   0x7   :  { %6413 = sst [smem:[#allocation46_spill]] %s6368_s6 }
   0x8   :  { %6414 = sst [smem:[#allocation47_spill]] %s6369_s7 }
   0x9   :  { %6415 = sst [smem:[#allocation48_spill]] %s6370_s8 }
   0xa   :  { %6416 = sst [smem:[#allocation49_spill]] %s6373_s11 }
   0xb   :  { %6417 = sst [smem:[#allocation50_spill]] %s6377_s15 }
   0xc   :  { %6418 = sst [smem:[#allocation51_spill]] %s6378_s16 }
   0xd   :  { %6419 = sst [smem:[#allocation52_spill]] %s6380_s18 }
   0xe   :  { %6420 = sst [smem:[#allocation53_spill]] %s6381_s19 }
   0xf   :  { %6421 = sst [smem:[#allocation54_spill]] %s6382_s20 }
  0x10   :  { %25 = vsyncpa [#allocation3], 0 }
  0x11   :  { %27 = vsyncpa [#allocation3 + $0x1], 0 }
  0x12   :  { %28 = vsyncpa [#allocation6], 0 }
  0x13   :  { %30 = vsyncpa [#allocation6 + $0x1], 0 }
  0x14   :  { %31 = vsyncpa [#allocation10], 0 }
  0x15   :  { %32 = vsyncpa [#allocation13], 0 }
  0x16   :  { %33 = vsyncpa [#allocation16], 0 }
  0x17   :  { %34 = vsyncpa [#allocation19], 0 }
  0x18   :  { %35 = vsyncpa [#allocation22], 0 }
  0x19   :  { %36 = vsyncpa [#allocation4], 0 }
  0x1a   :  { %38 = vsyncpa [#allocation4 + $0x1], 0  ;;  %s5635_s1 = smov 0   ;;  %s5637_s22 = smov 0  }
  0x1b   :  { %s5639_s23 = smov 0   ;;  %s5641_s24 = smov 0  }
  0x1c LB: > { %6422 = sst [smem:[#allocation35_spill]] %s5480_s1  ;;  %s5656_s2 = sadd.s32 4294967295, %s5492_s24   ;;  %s5492_s24 = sphi %s5641_s24, %s6475_s24   ;;  %s5488_s23 = sphi %s5639_s23, %s6479_s23   ;;  %s5484_s22 = sphi %s5637_s22, %s6478_s22   ;;  %s5480_s1 = sphi %s5635_s1, %s6477_s1  }
  0x1d   : > { %s4007_s25 = sadd.s32 4294967294, %s5492_s24   ;;  %s5660_s3 = sadd.s32 1, %s5492_s24  }
  0x1e   : > { %6423 = sst [smem:[#allocation36_spill]] %s5660_s3  ;;  %s51_s26 = sadd.s32 1, %s5488_s23 }
  0x1f   : > { %s48_s27 = ssub.s32 %s5492_s24, %s5660_s3  ;;  %p58_p0 = scmp.ne.s32.totalorder %s5488_s23, %s5484_s22 }
  0x20   : > { %p49_p1 = scmp.eq.s32.totalorder %s48_s27, 0  ;;  %p59_p2 = scmp.eq.s32.totalorder %s5492_s24, 0 }
  0x21   : > { %p64_p3 = scmp.ne.s32.totalorder %s5484_s22, %s5480_s1  ;;  %p6393_p4 = scmp.eq.s32.totalorder %s5656_s2, 0 }
  0x22   : > { %s5672_s28 = scalar_select %p49_p1, %s5488_s23, %s51_s26  }
  0x23   : > { %p5674_p5 = por %p59_p2, %p58_p0  ;;  %p5680_p6 = por %p6393_p4, %p64_p3 }
  0x24   : > { %6424 = sst [smem:[#allocation37_spill]] %s5672_s28  ;;  %p502_p7 = scmp.eq.s32.totalorder %s5656_s2, 1 }
  0x25   : > { %s6425_s4 = scalar_select %p5674_p5, 1, 0 }
  0x26   : > { %s6426_s29 = scalar_select %p5680_p6, 1, 0 }
  0x27   : > { %p508_p8 = scmp.eq.s32.totalorder %s4007_s25, 1  ;;  %p4008_p9 = scmp.ge.s32.totalorder %s5492_s24, 1 }
  0x28   : > { %p515_p10 = scmp.lt.s32.totalorder %s5492_s24, 3  ;;  %p5687_p11 = por %p502_p7, %p58_p0 }
  0x29   : > { %p5691_p12 = por %p508_p8, %p64_p3  ;;  %s5494_s26 = smov [#allocation9]  }
  0x2a   : > { %s6427_s30 = scalar_select %p5687_p11, 1, 0 }
  0x2b   : > { %s6429_s0 = scalar_select %p5691_p12, 1, 0 }
  0x2c   : > { %6428 = sst [smem:[#allocation38_spill]] %s6427_s30  ;;  %p5695_p13 = pnand %p4008_p9, %p515_p10 }
  0x2d   : > { %6430 = sst [smem:[#allocation39_spill]] %s6429_s0  ;;  %s527_s27 = sshll.u32 %s5494_s26, 4  ;;  %s528_s27 = int_to_ptr.vmem [resolvable:$true] %s527_s27 }
  0x2e   : > { %s6431_s21 = scalar_select %p5695_p13, 1, 0 }
  0x2f   : > { %p4507_p1 = pneg %p5695_p13  ;;  %s5495_s28 = smov [#allocation12]  }
  0x30   : > { %s559_s3 = sshll.u32 %s5495_s28, 4  ;;  %s6433_s20 = sld [smem:[#allocation44_spill]]  ;;  %s5707_s3 = int_to_ptr.vmem [resolvable:$true] %s559_s3 }
  0x31   : > { %p5703_p2 = pnand %p4507_p1, %p6393_p4 }
  0x33   : > { %p5717_p3 = pneg %p5703_p2 }
  0x36   : > { %s5094_s30 = scalar_lea.hbm %s6433_s20, 8192 }
  0x37   : > { %p5095_p0 = scmp.ne.s32.totalorder %s6433_s20, %s5094_s30  ;;  %p5101_p9 = scmp.lt.u32.totalorder %s5094_s30, %s6433_s20 }
  0x39   : > { %p5097_p7 = pnand %p5717_p3, %p5095_p0 }
  0x3b   : > { %p5098_p8 = pneg %p5097_p7 }
  0x3d   : > { %p5103_p10 = pnand %p5101_p9, %p5098_p8 }
  0x3f   : > { %5106 = shalt.err (!%p5103_p10)
}
  0x40   : > { %s5107_s1 = scalar_lea.vmem %s528_s27, 8192  ;;  %p5115_p11 = scmp.lt.s32.totalorder %s528_s27, %s528_s27 }
  0x41   : > { %p5108_p1 = scmp.ne.s32.totalorder %s528_s27, %s5107_s1  ;;  %p5116_p6 = scmp.lt.s32.totalorder %s5107_s1, %s5107_s1 }
  0x43   : > { %p5110_p4 = pnand %p5108_p1, %p5717_p3  ;;  %p5117_p13 = por %p5116_p6, %p5115_p11 }
  0x45   : > { %p5111_p12 = pneg %p5110_p4 }
  0x47   : > { %p5118_p5 = pnand %p5117_p13, %p5111_p12 }
  0x49   : > { %5121 = shalt.err (!%p5118_p5)
}
  0x4a   : > { %s6400_s18 = smov 128   ;;  %s6402_s19 = smov 8  }
  0x4b   : > { %4510 = dma.hbm_to_vmem [thread:$0]  (!%p5703_p2), %s6433_s20, 8192, %s528_s27, [#allocation10], %s6400_s18, %s6400_s18, %s6402_s19  }
  0x4c   : > { %s6435_s8 = sld [smem:[#allocation48_spill]] }
  0x52   : > { %s5122_s15 = scalar_lea.hbm %s6435_s8, 8192 }
  0x53   : > { %p5123_p4 = scmp.ne.s32.totalorder %s6435_s8, %s5122_s15  ;;  %p5129_p11 = scmp.lt.u32.totalorder %s5122_s15, %s6435_s8 }
  0x55   : > { %p5125_p5 = pnand %p5123_p4, %p5717_p3 }
  0x57   : > { %p5126_p6 = pneg %p5125_p5 }
  0x59   : > { %p5131_p12 = pnand %p5129_p11, %p5126_p6 }
  0x5b   : > { %5134 = shalt.err (!%p5131_p12)
}
  0x5c   : > { %s5135_s27 = scalar_lea.vmem %s5707_s3, 8192  ;;  %p5143_p8 = scmp.lt.s32.totalorder %s5707_s3, %s5707_s3 }
  0x5d   : > { %p5136_p13 = scmp.ne.s32.totalorder %s5707_s3, %s5135_s27  ;;  %p5144_p9 = scmp.lt.s32.totalorder %s5135_s27, %s5135_s27 }
  0x5f   : > { %p5138_p0 = pnand %p5136_p13, %p5717_p3  ;;  %p5145_p10 = por %p5144_p9, %p5143_p8 }
  0x61   : > { %p5139_p7 = pneg %p5138_p0 }
  0x63   : > { %p5146_p1 = pnand %p5145_p10, %p5139_p7 }
  0x65   : > { %5149 = shalt.err (!%p5146_p1)
}
  0x66   : > { %4516 = dma.hbm_to_vmem [thread:$0]  (!%p5703_p2), %s6435_s8, 8192, %s5707_s3, [#allocation13], %s6400_s18, %s6400_s18, %s6402_s19  }
  0x67   : > { %s5498_s11 = smov [#allocation15]   ;;  %s5150_s0 = scalar_lea.hbm %s6372_s10, 512 }
  0x68   : > { %s585_s15 = sshll.u32 %s5498_s11, 4  ;;  %p5151_p4 = scmp.ne.s32.totalorder %s6372_s10, %s5150_s0  ;;  %s586_s15 = int_to_ptr.vmem [resolvable:$true] %s585_s15 }
  0x69   : > { %p5157_p11 = scmp.lt.u32.totalorder %s5150_s0, %s6372_s10 }
  0x6a   : > { %p5153_p5 = pnand %p5151_p4, %p5717_p3 }
  0x6c   : > { %p5154_p6 = pneg %p5153_p5 }
  0x6e   : > { %p5159_p12 = pnand %p5157_p11, %p5154_p6 }
  0x70   : > { %5162 = shalt.err (!%p5159_p12)
}
  0x71   : > { %s5163_s3 = scalar_lea.vmem %s586_s15, 512  ;;  %p5171_p8 = scmp.lt.s32.totalorder %s586_s15, %s586_s15 }
  0x72   : > { %p5164_p13 = scmp.ne.s32.totalorder %s586_s15, %s5163_s3  ;;  %p5172_p9 = scmp.lt.s32.totalorder %s5163_s3, %s5163_s3 }
  0x74   : > { %p5166_p0 = pnand %p5164_p13, %p5717_p3  ;;  %p5173_p10 = por %p5172_p9, %p5171_p8 }
  0x76   : > { %p5167_p7 = pneg %p5166_p0 }
  0x78   : > { %p5174_p1 = pnand %p5173_p10, %p5167_p7 }
  0x7a   : > { %5177 = shalt.err (!%p5174_p1)
}
  0x7b   : > { %s6404_s5 = smov 256   ;;  %s6405_s7 = smov 16  }
  0x7c   : > { %4522 = dma.hbm_to_vmem [thread:$0]  (!%p5703_p2), %s6372_s10, 512, %s586_s15, [#allocation16], %s6404_s5, %s6404_s5, %s6405_s7  }
  0x7d   : > { %s5501_s16 = smov [#allocation18]   ;;  %s5502_s0 = smov [#allocation11]  }
  0x7e   : > { %s615_s30 = sshll.u32 %s5501_s16, 4  ;;  %s543_s28 = sshll.u32 %s5502_s0, 4  ;;  %s616_s30 = int_to_ptr.vmem [resolvable:$true] %s615_s30  ;;  %s5783_s28 = int_to_ptr.vmem [resolvable:$true] %s543_s28 }
  0x7f   : > { %s5178_s3 = scalar_lea.hbm %s6375_s13, 16 }
  0x80   : > { %p5179_p4 = scmp.ne.s32.totalorder %s6375_s13, %s5178_s3  ;;  %p5185_p11 = scmp.lt.u32.totalorder %s5178_s3, %s6375_s13 }
  0x82   : > { %p5181_p5 = pnand %p5179_p4, %p5717_p3 }
  0x84   : > { %p5182_p6 = pneg %p5181_p5 }
  0x86   : > { %p5187_p12 = pnand %p5185_p11, %p5182_p6 }
  0x88   : > { %5190 = shalt.err (!%p5187_p12)
}
  0x89   : > { %s5191_s11 = scalar_lea.vmem %s616_s30, 16  ;;  %s5198_s16 = scalar_lea.vmem %s616_s30, 32 }
  0x8a   : > { %p5192_p13 = scmp.ne.s32.totalorder %s616_s30, %s5191_s11  ;;  %p5199_p8 = scmp.lt.s32.totalorder %s616_s30, %s616_s30 }
  0x8b   : > { %p5200_p9 = scmp.lt.s32.totalorder %s5198_s16, %s5191_s11 }
  0x8c   : > { %p5194_p0 = pnand %p5192_p13, %p5717_p3 }
  0x8d   : > { %p5201_p10 = por %p5200_p9, %p5199_p8 }
  0x8e   : > { %p5195_p7 = pneg %p5194_p0 }
  0x90   : > { %p5202_p1 = pnand %p5201_p10, %p5195_p7 }
  0x92   : > { %5205 = shalt.err (!%p5202_p1)
}
  0x93   : > { %4528 = dma.hbm_to_vmem [thread:$0]  (!%p5703_p2), %s6375_s13, 16, %s616_s30, [#allocation19]  }
  0x94   : > { %s6436_s6 = sld [smem:[#allocation46_spill]] }
  0x9a   : > { %s5206_s27 = scalar_lea.hbm %s6436_s6, 8192 }
  0x9b   : > { %p5207_p4 = scmp.ne.s32.totalorder %s6436_s6, %s5206_s27  ;;  %p5213_p11 = scmp.lt.u32.totalorder %s5206_s27, %s6436_s6 }
  0x9d   : > { %p5209_p5 = pnand %p5207_p4, %p5717_p3 }
  0x9f   : > { %p5210_p6 = pneg %p5209_p5 }
  0xa1   : > { %p5215_p12 = pnand %p5213_p11, %p5210_p6 }
  0xa3   : > { %5218 = shalt.err (!%p5215_p12)
}
  0xa4   : > { %s5219_s30 = scalar_lea.vmem %s5783_s28, 8192  ;;  %p5227_p8 = scmp.lt.s32.totalorder %s5783_s28, %s5783_s28 }
  0xa5   : > { %p5220_p13 = scmp.ne.s32.totalorder %s5783_s28, %s5219_s30  ;;  %p5228_p9 = scmp.lt.s32.totalorder %s5219_s30, %s5219_s30 }
  0xa7   : > { %p5222_p0 = pnand %p5220_p13, %p5717_p3  ;;  %p5229_p10 = por %p5228_p9, %p5227_p8 }
  0xa9   : > { %p5223_p7 = pneg %p5222_p0 }
  0xab   : > { %p5230_p1 = pnand %p5229_p10, %p5223_p7 }
  0xad   : > { %5233 = shalt.err (!%p5230_p1)
}
  0xae   : > { %s6437_s16 = smov 8   ;;  %s6438_s18 = smov 128  }
  0xaf   : > { %4513 = dma.hbm_to_vmem [thread:$0]  (!%p5703_p2), %s6436_s6, 8192, %s5783_s28, [#allocation10], %s6438_s18, %s6438_s18, %s6437_s16  }
  0xb0   : > { %s5503_s1 = smov [#allocation14]   ;;  %s5504_s3 = smov [#allocation17]  }
  0xb1   : > { %s572_s27 = sshll.u32 %s5503_s1, 4  ;;  %s601_s20 = sshll.u32 %s5504_s3, 4  ;;  %s573_s27 = int_to_ptr.vmem [resolvable:$true] %s572_s27  ;;  %s5829_s20 = int_to_ptr.vmem [resolvable:$true] %s601_s20 }
  0xb2   : > { %s5234_s30 = scalar_lea.hbm %s6371_s9, 2048 }
  0xb3   : > { %p5235_p4 = scmp.ne.s32.totalorder %s6371_s9, %s5234_s30  ;;  %p5241_p11 = scmp.lt.u32.totalorder %s5234_s30, %s6371_s9 }
  0xb5   : > { %p5237_p5 = pnand %p5235_p4, %p5717_p3 }
  0xb7   : > { %p5238_p6 = pneg %p5237_p5 }
  0xb9   : > { %p5243_p12 = pnand %p5241_p11, %p5238_p6 }
  0xbb   : > { %5246 = shalt.err (!%p5243_p12)
}
  0xbc   : > { %s5247_s0 = scalar_lea.vmem %s573_s27, 2048  ;;  %p5255_p8 = scmp.lt.s32.totalorder %s573_s27, %s573_s27 }
  0xbd   : > { %p5248_p13 = scmp.ne.s32.totalorder %s573_s27, %s5247_s0  ;;  %p5256_p9 = scmp.lt.s32.totalorder %s5247_s0, %s5247_s0 }
  0xbf   : > { %p5250_p0 = pnand %p5248_p13, %p5717_p3  ;;  %p5257_p10 = por %p5256_p9, %p5255_p8 }
  0xc1   : > { %p5251_p7 = pneg %p5250_p0 }
  0xc3   : > { %p5258_p1 = pnand %p5257_p10, %p5251_p7 }
  0xc5   : > { %5261 = shalt.err (!%p5258_p1)
}
  0xc6   : > { %4519 = dma.hbm_to_vmem [thread:$0]  (!%p5703_p2), %s6371_s9, 2048, %s573_s27, [#allocation13], %s6438_s18, %s6438_s18, %s6437_s16  }
  0xc7   : > { %s5262_s15 = scalar_lea.hbm %s6374_s12, 2048 }
  0xc8   : > { %p5263_p4 = scmp.ne.s32.totalorder %s6374_s12, %s5262_s15  ;;  %p5269_p11 = scmp.lt.u32.totalorder %s5262_s15, %s6374_s12 }
  0xca   : > { %p5265_p5 = pnand %p5263_p4, %p5717_p3 }
  0xcc   : > { %p5266_p6 = pneg %p5265_p5 }
  0xce   : > { %p5271_p12 = pnand %p5269_p11, %p5266_p6 }
  0xd0   : > { %5274 = shalt.err (!%p5271_p12)
}
  0xd1   : > { %s5275_s27 = scalar_lea.vmem %s5829_s20, 2048  ;;  %p5283_p8 = scmp.lt.s32.totalorder %s5829_s20, %s5829_s20 }
  0xd2   : > { %p5276_p13 = scmp.ne.s32.totalorder %s5829_s20, %s5275_s27  ;;  %p5284_p9 = scmp.lt.s32.totalorder %s5275_s27, %s5275_s27 }
  0xd4   : > { %p5278_p0 = pnand %p5276_p13, %p5717_p3  ;;  %p5285_p10 = por %p5284_p9, %p5283_p8 }
  0xd6   : > { %p5279_p7 = pneg %p5278_p0 }
  0xd8   : > { %p5286_p1 = pnand %p5285_p10, %p5279_p7 }
  0xda   : > { %5289 = shalt.err (!%p5286_p1)
}
  0xdb   : > { %s5505_s0 = smov 64   ;;  %s5506_s5 = smov 4  }
  0xdc   : > { %4525 = dma.hbm_to_vmem [thread:$0]  (!%p5703_p2), %s6374_s12, 2048, %s5829_s20, [#allocation16], %s5505_s0, %s5505_s0, %s5506_s5  }
  0xdd   : > { %s5507_s3 = smov [#allocation20]   ;;  %s5508_s11 = smov [#allocation21]  }
  0xde   : > { %s625_s15 = sshll.u32 %s5507_s3, 4  ;;  %s644_s30 = sshll.u32 %s5508_s11, 4  ;;  %s626_s15 = int_to_ptr.vmem [resolvable:$true] %s625_s15  ;;  %s5875_s30 = int_to_ptr.vmem [resolvable:$true] %s644_s30 }
  0xdf   : > { %s5290_s27 = scalar_lea.hbm %s6376_s14, 8192 }
  0xe0   : > { %p5291_p4 = scmp.ne.s32.totalorder %s6376_s14, %s5290_s27  ;;  %p5297_p11 = scmp.lt.u32.totalorder %s5290_s27, %s6376_s14 }
  0xe2   : > { %p5293_p5 = pnand %p5291_p4, %p5717_p3 }
  0xe4   : > { %p5294_p6 = pneg %p5293_p5 }
  0xe6   : > { %p5299_p12 = pnand %p5297_p11, %p5294_p6 }
  0xe8   : > { %5302 = shalt.err (!%p5299_p12)
}
  0xe9   : > { %s5303_s0 = scalar_lea.vmem %s626_s15, 8192  ;;  %p5311_p8 = scmp.lt.s32.totalorder %s626_s15, %s626_s15 }
  0xea   : > { %p5304_p13 = scmp.ne.s32.totalorder %s626_s15, %s5303_s0  ;;  %p5312_p9 = scmp.lt.s32.totalorder %s5303_s0, %s5303_s0 }
  0xec   : > { %p5306_p0 = pnand %p5304_p13, %p5717_p3  ;;  %p5313_p10 = por %p5312_p9, %p5311_p8 }
  0xee   : > { %p5307_p7 = pneg %p5306_p0 }
  0xf0   : > { %p5314_p1 = pnand %p5313_p10, %p5307_p7 }
  0xf2   : > { %5317 = shalt.err (!%p5314_p1)
}
  0xf3   : > { %4531 = dma.hbm_to_vmem [thread:$0]  (!%p5703_p2), %s6376_s14, 8192, %s626_s15, [#allocation19], %s6438_s18, %s6438_s18, %s6437_s16  }
  0xf4   : > { %s5318_s3 = scalar_lea.hbm %s6379_s17, 512 }
  0xf5   : > { %p5319_p4 = scmp.ne.s32.totalorder %s6379_s17, %s5318_s3  ;;  %p5325_p11 = scmp.lt.u32.totalorder %s5318_s3, %s6379_s17 }
  0xf7   : > { %p5321_p5 = pnand %p5319_p4, %p5717_p3 }
  0xf9   : > { %p5322_p6 = pneg %p5321_p5 }
  0xfb   : > { %p5327_p12 = pnand %p5325_p11, %p5322_p6 }
  0xfd   : > { %5330 = shalt.err (!%p5327_p12)
}
  0xfe   : > { %s5331_s16 = scalar_lea.vmem %s5875_s30, 512  ;;  %p5339_p8 = scmp.lt.s32.totalorder %s5875_s30, %s5875_s30 }
  0xff   : > { %p5332_p13 = scmp.ne.s32.totalorder %s5875_s30, %s5331_s16  ;;  %p5340_p9 = scmp.lt.s32.totalorder %s5331_s16, %s5331_s16 }
 0x101   : > { %p5334_p0 = pnand %p5332_p13, %p5717_p3  ;;  %p5341_p10 = por %p5340_p9, %p5339_p8 }
 0x103   : > { %p5335_p7 = pneg %p5334_p0 }
 0x105   : > { %p5342_p1 = pnand %p5341_p10, %p5335_p7 }
 0x107   : > { %5345 = shalt.err (!%p5342_p1)
}
 0x108   : > { %s6439_s18 = smov 16   ;;  %s6440_s15 = smov 256  }
 0x109   : > { %4534 = dma.hbm_to_vmem [thread:$0]  (!%p5703_p2), %s6379_s17, 512, %s5875_s30, [#allocation22], %s6440_s15, %s6440_s15, %s6439_s18  }
 0x10a   : > { %p4018_p3 = scmp.ge.s32.totalorder %s5492_s24, 2 }
 0x10b   : > { %s5928_s26 = sand.u32 (!%p4018_p3), 1, %s5488_s23   ;;  %s4375_s25 = sshll.u32 (!%p4018_p3), %s5492_s24, 9 }
 0x10c   : > { %660 = sbr.rel (%p4018_p3) target bundleno = 353 (0x161), region = 80  ;;  %s6406_s0 = sshll.u32 (!%p4018_p3), %s5928_s26, 5 }
 0x10d   : > { %s6441_s30 = sld [smem:[#allocation40_spill]] (!%p4018_p3)  ;;  %s668_s1 = scalar_lea.vmem (!%p4018_p3), [#allocation2], %s6406_s0 }
 0x10e   : > { %s676_s3 = sshll.u32 (!%p4018_p3), %s668_s1, 4  ;;  %s665_s11 = scalar_lea.sflag (!%p4018_p3), [#allocation3], %s5928_s26  ;;  %s5941_s3 = int_to_ptr.vmem [resolvable:$true] %s676_s3 }
 0x10f   : > { %p6442_p4 = scmp.ne.s32.totalorder (!%p4018_p3), %s6425_s4, 0 }
 0x113   : > { %s5937_s5 = scalar_lea.hbm %s6441_s30, %s4375_s25  ;;  %s5350_s16 = scalar_lea.hbm %s6441_s30, 1024 }
 0x114   : > { %s5346_s19 = scalar_lea.hbm %s5937_s5, 512  ;;  %p5351_p11 = scmp.lt.u32.totalorder %s5937_s5, %s6441_s30 }
 0x115   : > { %p5347_p2 = scmp.ne.s32.totalorder %s5937_s5, %s5346_s19  ;;  %p5352_p12 = scmp.lt.u32.totalorder %s5350_s16, %s5346_s19 }
 0x116   : > { %p5354_p0 = scmp.lt.u32.totalorder %s5346_s19, %s5937_s5 }
 0x117   : > { %p5348_p5 = pnand %p5347_p2, %p6442_p4  ;;  %p5353_p13 = por %p5352_p12, %p5351_p11 }
 0x119   : > { %p5349_p6 = pneg %p5348_p5  ;;  %p5355_p7 = por %p5354_p0, %p5353_p13 }
 0x11b   : > { %p5356_p8 = pnand %p5355_p7, %p5349_p6 }
 0x11d   : > { %5359 = shalt.err (!%p5356_p8)
}
 0x11e   : > { %s5360_s7 = scalar_lea.vmem %s5941_s3, 512  ;;  %s5509_s20 = smov [#allocation2]  }
 0x11f   : > { %p5361_p9 = scmp.ne.s32.totalorder %s5941_s3, %s5360_s7  ;;  %s5364_s6 = sshll.u32 %s5509_s20, 4  ;;  %s5365_s6 = int_to_ptr.vmem [resolvable:$false] %s5364_s6 }
 0x120   : > { %s5366_s8 = scalar_lea.vmem %s5365_s6, 1024  ;;  %p5367_p2 = scmp.lt.s32.totalorder %s5941_s3, %s5365_s6 }
 0x121   : > { %p5362_p10 = pnand %p5361_p9, %p6442_p4  ;;  %p5368_p5 = scmp.lt.s32.totalorder %s5366_s8, %s5360_s7 }
 0x123   : > { %p5363_p1 = pneg %p5362_p10  ;;  %p5369_p11 = por %p5368_p5, %p5367_p2 }
 0x125   : > { %p5370_p12 = pnand %p5369_p11, %p5363_p1 }
 0x127   : > { %5373 = shalt.err (!%p5370_p12)
}
 0x128   : > { %s5510_s1 = smov 256   ;;  %s5511_s19 = smov 16  }
 0x129   : > { %4474 = dma.hbm_to_vmem [thread:$0]  (%p6442_p4), %s5937_s5, 512, %s5941_s3, %s665_s11, %s5510_s1, %s5510_s1, %s5511_s19  }
 0x12a   : > { %s686_s28 = sand.u32 1, %s5492_s24   ;;  %s4454_s27 = smul.u32 96, %s5928_s26 }
 0x12b   : > { %s4475_s16 = scalar_select %p6442_p4, [#allocation0], [#allocation26] }
 0x12c   : > { %s6443_s7 = sld [smem:[#allocation41_spill]]  ;;  %s5512_s5 = smov 1024  }
 0x12d   : > { %4476 = sst [smem:[#allocation25]] (%p6442_p4), %s5512_s5  ;;  %s690_s11 = scalar_lea.vmem [#allocation5], %s4454_s27 }
 0x12e   : > { %s702_s3 = sld [smem:[%s4475_s16]]   ;;  %s710_s6 = sshll.u32 %s690_s11, 4  ;;  %s711_s6 = int_to_ptr.vmem [resolvable:$true] %s710_s6 }
 0x12f   : > { %s5513_s8 = smov 512   ;;  %s5514_s1 = smov 2  }
 0x130   : > { %4477 = sst [smem:[#allocation25 + $0x1]] (%p6442_p4), %s5513_s8  ;;  %s5515_s19 = smov 256  }
 0x131   : > { %4478 = sst [smem:[#allocation25 + $0x2]] (%p6442_p4), %s5514_s1  ;;  %s5516_s18 = smov 16  }
 0x132   : > { %s697_s20 = scalar_lea.hbm %s6443_s7, %s4375_s25  ;;  %4479 = sst [smem:[#allocation25 + $0x3]] (%p6442_p4), %s5515_s19 }
 0x133   : > { %4480 = sst [smem:[#allocation25 + $0x4]] (%p6442_p4), %s5515_s19  ;;  %s5988_s27 = scalar_lea.sflag [#allocation6], %s686_s28 }
 0x134   : > { %s4026_s25 = sshll.u32 %s702_s3, 26  ;;  %4481 = sst [smem:[#allocation25 + $0x5]] (%p6442_p4), %s5516_s18 }
 0x135   : > { %s4027_s16 = sadd.s32 134217728, %s4026_s25  ;;  %s5517_s15 = smov [#allocation24]  }
 0x136   : > { %4482 = dma.general (%p6442_p4), %s697_s20, 1536, %s711_s6, %s5988_s27, %s5517_s15, [#allocation25], %s4027_s16, 0  }
 0x137   : > { %s4028_s7 = sshll.u32 %s5928_s26, 3  ;;  %s4378_s5 = sshll.u32 %s5492_s24, 7 }
 0x138   : > { %s6444_s1 = sld [smem:[#allocation42_spill]]  ;;  %s737_s28 = scalar_lea.vmem [#allocation7], %s4028_s7 }
 0x139   : > { %s744_s3 = sshll.u32 %s737_s28, 4  ;;  %s6000_s3 = int_to_ptr.vmem [resolvable:$true] %s744_s3 }
 0x13e   : > { %s6445_s0 = smov %s6444_s1  ;;  %s5998_s19 = scalar_lea.hbm %s6444_s1, %s4378_s5 }
 0x13f   : > { %s5374_s25 = scalar_lea.hbm %s5998_s19, 128  ;;  %s5378_s18 = scalar_lea.hbm %s6445_s0, 256 }
 0x140   : > { %p5375_p6 = scmp.ne.s32.totalorder %s5998_s19, %s5374_s25  ;;  %p5379_p7 = scmp.lt.u32.totalorder %s5998_s19, %s6445_s0 }
 0x141   : > { %p5380_p8 = scmp.lt.u32.totalorder %s5378_s18, %s5374_s25  ;;  %p5382_p10 = scmp.lt.u32.totalorder %s5374_s25, %s5998_s19 }
 0x142   : > { %p5376_p13 = pnand %p5375_p6, %p6442_p4 }
 0x143   : > { %p5381_p9 = por %p5380_p8, %p5379_p7 }
 0x144   : > { %p5377_p0 = pneg %p5376_p13 }
 0x145   : > { %p5383_p1 = por %p5382_p10, %p5381_p9 }
 0x147   : > { %p5384_p2 = pnand %p5383_p1, %p5377_p0 }
 0x149   : > { %5387 = shalt.err (!%p5384_p2)
}
 0x14a   : > { %s5388_s7 = scalar_lea.vmem %s6000_s3, 128  ;;  %s5518_s5 = smov [#allocation7]  }
 0x14b   : > { %p5389_p5 = scmp.ne.s32.totalorder %s6000_s3, %s5388_s7  ;;  %s5392_s11 = sshll.u32 %s5518_s5, 4  ;;  %s5393_s11 = int_to_ptr.vmem [resolvable:$false] %s5392_s11 }
 0x14c   : > { %s5394_s8 = scalar_lea.vmem %s5393_s11, 256  ;;  %p5395_p6 = scmp.lt.s32.totalorder %s6000_s3, %s5393_s11 }
 0x14d   : > { %p5390_p11 = pnand %p5389_p5, %p6442_p4  ;;  %p5396_p13 = scmp.lt.s32.totalorder %s5394_s8, %s5388_s7 }
 0x14f   : > { %p5391_p12 = pneg %p5390_p11  ;;  %p5397_p7 = por %p5396_p13, %p5395_p6 }
 0x151   : > { %p5398_p8 = pnand %p5397_p7, %p5391_p12 }
 0x153   : > { %5401 = shalt.err (!%p5398_p8)
}
 0x154   : > { %s5519_s1 = smov 64   ;;  %s5520_s28 = smov 4  }
 0x155   : > { %4483 = dma.hbm_to_vmem [thread:$0]  (%p6442_p4), %s5998_s19, 128, %s6000_s3, %s5988_s27, %s5519_s1, %s5519_s1, %s5520_s28  }
 0x156   : > { %753 = sbr.rel (!%p6442_p4) target bundleno = 353 (0x161), region = 96  ;;  %s4379_s25 = sshll.u32 (%p6442_p4), %s5492_s24, 4 }
 0x157   : > { %s6446_s18 = sld [smem:[#allocation43_spill]] (%p6442_p4)  ;;  %s6447_s15 = sshll.u32 (%p6442_p4), %s5928_s26, 5 }
 0x158   : > { %s757_s7 = scalar_lea.vmem (%p6442_p4), [#allocation8], %s6447_s15 }
 0x15d   : > { %s760_s16 = scalar_lea.vmem %s6446_s18, %s4379_s25 }
 0x15e   : > { %v794_v0 = vld [vmem:[%s760_s16] sm:$0xff]  ;;  %v796_v1 = vld [vmem:[%s760_s16 + $0x8] sm:$0xff] }
 0x15f   : > { %v798_v2 = vld [vmem:[%s760_s16 + $0x20] sm:$0xff]  ;;  %795 = vst [vmem:[%s757_s7] sm:$0xff] %v794_v0  ;;  %797 = vst [vmem:[%s757_s7 + $0x8] sm:$0xff] %v796_v1  ;;  %v800_v3 = vld [vmem:[%s760_s16 + $0x28] sm:$0xff] }
 0x160   : > { %799 = vst [vmem:[%s757_s7 + $0x10] sm:$0xff] %v798_v2  ;;  %801 = vst [vmem:[%s757_s7 + $0x18] sm:$0xff] %v800_v3 }
 0x161 PF: > { %p6448_p4 = scmp.ne.s32.totalorder %s6431_s21, 0 }
 0x162   : > { %s6035_s4 = sand.u32 (!%p6448_p4), 1, %s5484_s22   ;;  %p6449_p0 = scmp.ne.s32.totalorder (!%p6448_p4), %s6426_s29, 0 }
 0x163   : > { %810 = sbr.rel (%p6448_p4) target bundleno = 2032 (0x7f0), region = 134  ;;  %s4035_s27 = sshll.u32 (!%p6448_p4), %s6035_s4, 5 }
 0x164   : > { %s813_s19 = scalar_lea.sflag (!%p6448_p4), [#allocation3], %s6035_s4  ;;  %s6039_s26 = scalar_lea.vmem (!%p6448_p4), [#allocation2], %s4035_s27 }
 0x16a   : > { %5447 = dma.done.wait (%p6449_p0), %s813_s19, 512  }
 0x16b   : > { %5449 = vsyncadd (%p6449_p0), %s813_s19, 4294966784  ;;  %s821_s21 = sand.u32 1, %s5656_s2   ;;  %s4455_s3 = smul.u32 96, %s6035_s4 }
 0x16c   : > { %s822_s5 = scalar_lea.sflag [#allocation6], %s821_s21 }
 0x16d   : > { %s6047_s11 = scalar_lea.vmem [#allocation5], %s4455_s3 }
 0x16e   : > { %5451 = dma.done.wait (%p6449_p0), %s822_s5, 1664  }
 0x16f   : > { %5453 = vsyncadd (%p6449_p0), %s822_s5, 4294965632  ;;  %s4036_s8 = sshll.u32 %s6035_s4, 3  ;;  %s6056_s28 = scalar_lea.vmem [#allocation8], %s4035_s27 }
 0x170   : > { %s6054_s1 = scalar_lea.vmem [#allocation7], %s4036_s8  ;;  %p6450_p9 = scmp.eq.s32.totalorder %s5656_s2, 0 }
 0x172   : > { %5455 = dma.done.wait (%p6450_p9), [#allocation10], 16384   ;;  %p6451_p10 = pmov %p6450_p9 }
 0x173   : > { %p6452_p1 = pmov %p6450_p9 }
 0x174   : > { %5457 = vsyncadd (%p6451_p10), [#allocation10], 4294950912 }
 0x175   : > { %5459 = dma.done.wait (%p6452_p1), [#allocation13], 10240   ;;  %p6453_p2 = pmov %p6452_p1 }
 0x176   : > { %p6454_p5 = pmov %p6452_p1 }
 0x177   : > { %5461 = vsyncadd (%p6453_p2), [#allocation13], 4294957056 }
 0x178   : > { %5463 = dma.done.wait (%p6454_p5), [#allocation16], 2560   ;;  %p6455_p11 = pmov %p6452_p1 }
 0x179   : > { %p6456_p12 = pmov %p6452_p1 }
 0x17a   : > { %5465 = vsyncadd (%p6455_p11), [#allocation16], 4294964736 }
 0x17b   : > { %5467 = dma.done.wait (%p6456_p12), [#allocation19], 8208   ;;  %p6457_p6 = pmov %p6452_p1 }
 0x17c   : > { %p6458_p13 = pmov %p6452_p1 }
 0x17d   : > { %5469 = vsyncadd (%p6457_p6), [#allocation19], 4294959088 }
 0x17e   : > { %5471 = dma.done.wait (%p6458_p13), [#allocation22], 512   ;;  %p6459_p7 = pmov %p6452_p1 }
 0x17f   : > { %v4631_v4 = vld [vmem:[#allocation9 + $0x4] ss:$8 sps:$4 sm:$0xff]   ;;  %v4635_v6 = vld [vmem:[#allocation9] ss:$8 sps:$4 sm:$0xff]   ;;  %v4637_v8 = vld [vmem:[#allocation9 + $0x14] ss:$8 sps:$4 sm:$0xff]  }
 0x180   : > { %5473 = vsyncadd (%p6459_p7), [#allocation22], 4294966784  ;;  %v4633_v5 = vld [vmem:[#allocation11 + $0x4] ss:$8 sps:$4 sm:$0xff]   ;;  %1443 = vmatprep.subr.bf16.mxu0 %v4631_v4  ;;  %v4636_v7 = vld [vmem:[#allocation11] ss:$8 sps:$4 sm:$0xff]  }
 0x181   : > { %1925 = vmatprep.subr.bf16.mxu1 %v4633_v5  ;;  %1444 = vmatpush1.bf16.msra.mxu0 %v4635_v6  ;;  %v4639_v9 = vld [vmem:[#allocation11 + $0x14] ss:$8 sps:$4 sm:$0xff]   ;;  %v4641_v10 = vld [vmem:[#allocation9 + $0x10] ss:$8 sps:$4 sm:$0xff]   ;;  %v4643_v12 = vld [vmem:[#allocation9 + $0x24] ss:$8 sps:$4 sm:$0xff]  }
 0x182   : > { %1926 = vmatpush1.bf16.msra.mxu1 %v4636_v7  ;;  %1445 = vmatprep.subr.bf16.mxu0 %v4637_v8  ;;  %v4642_v11 = vld [vmem:[#allocation11 + $0x10] ss:$8 sps:$4 sm:$0xff]   ;;  %v4645_v13 = vld [vmem:[#allocation11 + $0x24] ss:$8 sps:$4 sm:$0xff]   ;;  %v4647_v14 = vld [vmem:[#allocation9 + $0x20] ss:$8 sps:$4 sm:$0xff]  }
 0x183   : > { %1927 = vmatprep.subr.bf16.mxu1 %v4639_v9  ;;  %v4648_v15 = vld [vmem:[#allocation11 + $0x20] ss:$8 sps:$4 sm:$0xff]   ;;  %v4649_v16 = vld [vmem:[#allocation9 + $0x34] ss:$8 sps:$4 sm:$0xff]   ;;  %v4653_v18 = vld [vmem:[#allocation9 + $0x30] ss:$8 sps:$4 sm:$0xff]  }
 0x184   : > { %v4651_v17 = vld [vmem:[#allocation11 + $0x34] ss:$8 sps:$4 sm:$0xff]   ;;  %v4654_v19 = vld [vmem:[#allocation11 + $0x30] ss:$8 sps:$4 sm:$0xff]   ;;  %v4655_v20 = vld [vmem:[#allocation9 + $0x44] ss:$8 sps:$4 sm:$0xff]  }
 0x185   : > { %1446 = vmatpush1.bf16.msra.mxu0 %v4641_v10  ;;  %v4657_v21 = vld [vmem:[#allocation11 + $0x44] ss:$8 sps:$4 sm:$0xff]   ;;  %v4659_v22 = vld [vmem:[#allocation9 + $0x40] ss:$8 sps:$4 sm:$0xff]   ;;  %v4661_v24 = vld [vmem:[#allocation9 + $0x54] ss:$8 sps:$4 sm:$0xff]  }
 0x186   : > { %1928 = vmatpush1.bf16.msra.mxu1 %v4642_v11  ;;  %1447 = vmatprep.subr.bf16.mxu0 %v4643_v12  ;;  %v4660_v23 = vld [vmem:[#allocation11 + $0x40] ss:$8 sps:$4 sm:$0xff]   ;;  %v4663_v25 = vld [vmem:[#allocation11 + $0x54] ss:$8 sps:$4 sm:$0xff]   ;;  %v4665_v26 = vld [vmem:[#allocation9 + $0x50] ss:$8 sps:$4 sm:$0xff]  }
 0x187   : > { %1929 = vmatprep.subr.bf16.mxu1 %v4645_v13  ;;  %v4666_v27 = vld [vmem:[#allocation11 + $0x50] ss:$8 sps:$4 sm:$0xff]   ;;  %v4667_v28 = vld [vmem:[#allocation9 + $0x64] ss:$8 sps:$4 sm:$0xff]   ;;  %v4671_v30 = vld [vmem:[#allocation9 + $0x60] ss:$8 sps:$4 sm:$0xff]  }
 0x188   : > { %v4669_v29 = vld [vmem:[#allocation11 + $0x64] ss:$8 sps:$4 sm:$0xff]   ;;  %v4672_v31 = vld [vmem:[#allocation11 + $0x60] ss:$8 sps:$4 sm:$0xff]   ;;  %v4673_v32 = vld [vmem:[#allocation9 + $0x74] ss:$8 sps:$4 sm:$0xff]  }
 0x189   : > { %1448 = vmatpush1.bf16.msra.mxu0 %v4647_v14  ;;  %v4675_v33 = vld [vmem:[#allocation11 + $0x74] ss:$8 sps:$4 sm:$0xff]   ;;  %v4677_v34 = vld [vmem:[#allocation9 + $0x70] ss:$8 sps:$4 sm:$0xff]   ;;  %v4679_v36 = vld [vmem:[#allocation9 + $0x84] ss:$8 sps:$4 sm:$0xff]  }
 0x18a   : > { %1930 = vmatpush1.bf16.msra.mxu1 %v4648_v15  ;;  %1449 = vmatprep.subr.bf16.mxu0 %v4649_v16  ;;  %v4678_v35 = vld [vmem:[#allocation11 + $0x70] ss:$8 sps:$4 sm:$0xff]   ;;  %v4681_v37 = vld [vmem:[#allocation11 + $0x84] ss:$8 sps:$4 sm:$0xff]   ;;  %v4683_v38 = vld [vmem:[#allocation9 + $0x80] ss:$8 sps:$4 sm:$0xff]  }
 0x18b   : > { %1931 = vmatprep.subr.bf16.mxu1 %v4651_v17  ;;  %v4684_v39 = vld [vmem:[#allocation11 + $0x80] ss:$8 sps:$4 sm:$0xff]   ;;  %v4685_v40 = vld [vmem:[#allocation9 + $0x94] ss:$8 sps:$4 sm:$0xff]   ;;  %v4689_v42 = vld [vmem:[#allocation9 + $0x90] ss:$8 sps:$4 sm:$0xff]  }
 0x18c   : > { %v4687_v41 = vld [vmem:[#allocation11 + $0x94] ss:$8 sps:$4 sm:$0xff]   ;;  %v4690_v43 = vld [vmem:[#allocation11 + $0x90] ss:$8 sps:$4 sm:$0xff]   ;;  %v4691_v44 = vld [vmem:[#allocation9 + $0xa4] ss:$8 sps:$4 sm:$0xff]  }
 0x18d   : > { %1450 = vmatpush1.bf16.msra.mxu0 %v4653_v18  ;;  %v4693_v45 = vld [vmem:[#allocation11 + $0xa4] ss:$8 sps:$4 sm:$0xff]   ;;  %v4695_v46 = vld [vmem:[#allocation9 + $0xa0] ss:$8 sps:$4 sm:$0xff]   ;;  %v4697_v48 = vld [vmem:[#allocation9 + $0xb4] ss:$8 sps:$4 sm:$0xff]  }
 0x18e   : > { %1932 = vmatpush1.bf16.msra.mxu1 %v4654_v19  ;;  %1451 = vmatprep.subr.bf16.mxu0 %v4655_v20  ;;  %v4696_v47 = vld [vmem:[#allocation11 + $0xa0] ss:$8 sps:$4 sm:$0xff]   ;;  %v4699_v49 = vld [vmem:[#allocation11 + $0xb4] ss:$8 sps:$4 sm:$0xff]   ;;  %v4701_v50 = vld [vmem:[#allocation9 + $0xb0] ss:$8 sps:$4 sm:$0xff]  }
 0x18f   : > { %1933 = vmatprep.subr.bf16.mxu1 %v4657_v21  ;;  %v4702_v51 = vld [vmem:[#allocation11 + $0xb0] ss:$8 sps:$4 sm:$0xff]   ;;  %v4729_v52 = vld [vmem:[%s6039_s26 + $0x4] ss:$16 sps:$4 sm:$0xff]   ;;  %v4707_v1 = vld [vmem:[#allocation9 + $0xc0] ss:$8 sps:$4 sm:$0xff]  }
 0x190   : > { %v4703_v53 = vld [vmem:[#allocation9 + $0xc4] ss:$8 sps:$4 sm:$0xff]   ;;  %v958_v55 = vld [vmem:[%s6047_s11] sm:$0xff]  ;;  %1475 = vmatprep.mubr.bf16.mxu0 %v4729_v52  ;;  %v4708_v2 = vld [vmem:[#allocation11 + $0xc0] ss:$8 sps:$4 sm:$0xff]   ;;  %vm2664_vm0 = vcmask 1040384  }
 0x191   : > { %1452 = vmatpush1.bf16.msra.mxu0 %v4659_v22  ;;  %v4705_v54 = vld [vmem:[#allocation11 + $0xc4] ss:$8 sps:$4 sm:$0xff]   ;;  %v962_v57 = vld [vmem:[%s6047_s11 + $0x20] sm:$0xff]  ;;  %v971_v60 = vunpack.c.h.bf16 %v958_v55  ;;  %v970_v9 = vunpack.c.l.bf16 %v958_v55  ;;  %v4754_v52 = vld [vmem:[#allocation9 + $0x140] ss:$8 sps:$4 sm:$0xff]   ;;  %vm5521_vm1 = vmmov 1  }
 0x192   : > { %1934 = vmatpush1.bf16.msra.mxu1 %v4660_v23  ;;  %1453 = vmatprep.subr.bf16.mxu0 %v4661_v24  ;;  %v960_v56 = vld [vmem:[%s6047_s11 + $0x10] sm:$0xff]  ;;  %v966_v59 = vld [vmem:[%s6047_s11 + $0x40] sm:$0xff]  ;;  %v979_v63 = vunpack.c.h.bf16 %v962_v57  ;;  %v978_v11 = vunpack.c.l.bf16 %v962_v57  ;;  %vm6118_vm2 = vmpackc.low %vm2664_vm0, %vm5521_vm1  ;;  %vm1020_vm3 = vcmask 72704   ;;  %s6462_s20 = sld [smem:[#allocation45_spill]]  ;;  %s6463_s16 = sld [smem:[#allocation47_spill]] }
 0x193   : > { %1935 = vmatprep.subr.bf16.mxu1 %v4663_v25  ;;  %v964_v58 = vld [vmem:[%s6047_s11 + $0x30] sm:$0xff]  ;;  %v975_v61 = vunpack.c.h.bf16 %v960_v56  ;;  %v987_v3 = vunpack.c.h.bf16 %v966_v59  ;;  %v4709_v5 = vld [vmem:[#allocation9 + $0xd4] ss:$8 sps:$4 sm:$0xff]   ;;  %v974_v10 = vunpack.c.l.bf16 %v960_v56  ;;  %v4713_v15 = vld [vmem:[#allocation9 + $0xd0] ss:$8 sps:$4 sm:$0xff]   ;;  %v986_v20 = vunpack.c.l.bf16 %v966_v59  ;;  %s6464_s27 = sld [smem:[#allocation49_spill]] }
 0x194   : > { %v968_v62 = vld [vmem:[%s6047_s11 + $0x50] sm:$0xff]  ;;  %v983_v0 = vunpack.c.h.bf16 %v964_v58  ;;  %v4711_v6 = vld [vmem:[#allocation11 + $0xd4] ss:$8 sps:$4 sm:$0xff]   ;;  %v996_v7 = vadd.f32 %v979_v63, %v971_v60  ;;  %v982_v12 = vunpack.c.l.bf16 %v964_v58  ;;  %v4714_v16 = vld [vmem:[#allocation11 + $0xd0] ss:$8 sps:$4 sm:$0xff]   ;;  %v994_v22 = vadd.f32 %v978_v11, %v970_v9  ;;  %s6465_s21 = sld [smem:[#allocation50_spill]] }
 0x195   : > { %1454 = vmatpush1.bf16.msra.mxu0 %v4665_v26  ;;  %v991_v4 = vunpack.c.h.bf16 %v968_v62  ;;  %v4715_v17 = vld [vmem:[#allocation9 + $0xe4] ss:$8 sps:$4 sm:$0xff]   ;;  %v990_v21 = vunpack.c.l.bf16 %v968_v62  ;;  %v4719_v24 = vld [vmem:[#allocation9 + $0xe0] ss:$8 sps:$4 sm:$0xff]   ;;  %v4721_v26 = vld [vmem:[#allocation9 + $0xf4] ss:$8 sps:$4 sm:$0xff]  }
 0x196   : > { %1936 = vmatpush1.bf16.msra.mxu1 %v4666_v27  ;;  %1455 = vmatprep.subr.bf16.mxu0 %v4667_v28  ;;  %v1004_v8 = vadd.f32 %v983_v0, %v975_v61  ;;  %v997_v13 = vadd.f32 %v996_v7, %v987_v3  ;;  %v4717_v18 = vld [vmem:[#allocation11 + $0xe4] ss:$8 sps:$4 sm:$0xff]   ;;  %v1002_v23 = vadd.f32 %v982_v12, %v974_v10  ;;  %v4720_v25 = vld [vmem:[#allocation11 + $0xe0] ss:$8 sps:$4 sm:$0xff]   ;;  %v4723_v27 = vld [vmem:[#allocation11 + $0xf4] ss:$8 sps:$4 sm:$0xff]  }
 0x197   : > { %1937 = vmatprep.subr.bf16.mxu1 %v4669_v29  ;;  %v995_v28 = vadd.f32 %v994_v22, %v986_v20  ;;  %v4765_v55 = vld [vmem:[#allocation11 + $0x154] ss:$8 sps:$4 sm:$0xff]   ;;  %v4760_v56 = vld [vmem:[#allocation9 + $0x150] ss:$8 sps:$4 sm:$0xff]   ;;  %v4768_v58 = vld [vmem:[#allocation9 + $0x164] ss:$8 sps:$4 sm:$0xff]  }
 0x198   : > { %v1005_v14 = vadd.f32 %v1004_v8, %v991_v4  ;;  %v1003_v29 = vadd.f32 %v1002_v23, %v990_v21  ;;  %v4763_v57 = vld [vmem:[#allocation11 + $0x150] ss:$8 sps:$4 sm:$0xff]   ;;  %v4771_v59 = vld [vmem:[#allocation11 + $0x164] ss:$8 sps:$4 sm:$0xff]   ;;  %v4766_v60 = vld [vmem:[#allocation9 + $0x160] ss:$8 sps:$4 sm:$0xff]  }
 0x199   : > { %1456 = vmatpush1.bf16.msra.mxu0 %v4671_v30  ;;  %v4725_v30 = vld [vmem:[#allocation9 + $0xf0] ss:$8 sps:$4 sm:$0xff]   ;;  %v4769_v61 = vld [vmem:[#allocation11 + $0x160] ss:$8 sps:$4 sm:$0xff]   ;;  %v4774_v62 = vld [vmem:[#allocation9 + $0x174] ss:$8 sps:$4 sm:$0xff]  }
 0x19a   : > { %1938 = vmatpush1.bf16.msra.mxu1 %v4672_v31  ;;  %1457 = vmatprep.subr.bf16.mxu0 %v4673_v32  ;;  %v1011_v19 = vpack.c.bf16 %v1005_v14, %v997_v13  ;;  %v4726_v31 = vld [vmem:[#allocation11 + $0xf0] ss:$8 sps:$4 sm:$0xff]   ;;  %v4732_v32 = vld [vmem:[#allocation9 + $0x104] ss:$8 sps:$4 sm:$0xff]   ;;  %v4777_v63 = vld [vmem:[#allocation11 + $0x174] ss:$8 sps:$4 sm:$0xff]  }
 0x19b   : > { %1939 = vmatprep.subr.bf16.mxu1 %v4675_v33  ;;  %v4735_v33 = vld [vmem:[#allocation11 + $0x104] ss:$8 sps:$4 sm:$0xff]   ;;  %v6088_v3 = vld [vmem:[%s6047_s11 + $0x8] sm:$0xff]  ;;  %v4781_v20 = vld [vmem:[#allocation11 + $0x180] ss:$8 sps:$4 sm:$0xff]   ;;  %s6466_s19 = sld [smem:[#allocation51_spill]] }
 0x19c   : > { %1957 = vmatprep.mubr.bf16.mxu1 %v1011_v19  ;;  %v4828_v0 = vld [vmem:[%s6039_s26 + $0xc] ss:$16 sps:$4 sm:$0xff]   ;;  %v973_v9 = vunpack.c.h.bf16 %v6088_v3  ;;  %v4778_v19 = vld [vmem:[#allocation9 + $0x180] ss:$8 sps:$4 sm:$0xff]   ;;  %s6467_s5 = sld [smem:[#allocation53_spill]]  ;;  %s6469_s29 = sld [smem:[#allocation38_spill]] }
 0x19d   : > { %1458 = vmatpush1.bf16.msra.mxu0 %v4677_v34  ;;  %v4727_v34 = vld [vmem:[%s6039_s26] ss:$16 sps:$4 sm:$0xff]   ;;  %v6091_v4 = vld [vmem:[%s6047_s11 + $0x18] sm:$0xff]  ;;  %v6100_v7 = vld [vmem:[%s6047_s11 + $0x48] sm:$0xff]  ;;  %s4383_s25 = sshll.u32 %s5656_s2, 8  ;;  %s6470_s15 = sld [smem:[#allocation54_spill]] }
 0x19e   : > { %1940 = vmatpush1.bf16.msra.mxu1 %v4678_v35  ;;  %1459 = vmatprep.subr.bf16.mxu0 %v4679_v36  ;;  %v1010_v35 = vpack.c.bf16 %v1003_v29, %v995_v28  ;;  %v4730_v36 = vld [vmem:[#allocation9 + $0x100] ss:$8 sps:$4 sm:$0xff]   ;;  %v977_v10 = vunpack.c.h.bf16 %v6091_v4  ;;  %v4780_v11 = vld [vmem:[#allocation9 + $0x184] ss:$8 sps:$4 sm:$0xff]   ;;  %v4786_v21 = vld [vmem:[#allocation9 + $0x194] ss:$8 sps:$4 sm:$0xff]  }
 0x19f   : > { %1941 = vmatprep.subr.bf16.mxu1 %v4681_v37  ;;  %v4733_v37 = vld [vmem:[#allocation11 + $0x100] ss:$8 sps:$4 sm:$0xff]   ;;  %v4783_v14 = vld [vmem:[#allocation11 + $0x184] ss:$8 sps:$4 sm:$0xff]   ;;  %s5527_s2 = smov [#allocation23]  }
 0x1a0   : > { %v6103_v8 = vld [vmem:[%s6047_s11 + $0x58] sm:$0xff] }
 0x1a1   : > { %1460 = vmatpush1.bf16.msra.mxu0 %v4683_v38  ;;  %v4738_v38 = vld [vmem:[#allocation9 + $0x114] ss:$8 sps:$4 sm:$0xff]   ;;  %v4792_v28 = vld [vmem:[#allocation9 + $0x1a4] ss:$8 sps:$4 sm:$0xff]  }
 0x1a2   : > { %1942 = vmatpush1.bf16.msra.mxu1 %v4684_v39  ;;  %1461 = vmatprep.subr.bf16.mxu0 %v4685_v40  ;;  %v4741_v39 = vld [vmem:[#allocation11 + $0x114] ss:$8 sps:$4 sm:$0xff]   ;;  %v4736_v40 = vld [vmem:[#allocation9 + $0x110] ss:$8 sps:$4 sm:$0xff]   ;;  %v4795_v29 = vld [vmem:[#allocation11 + $0x1a4] ss:$8 sps:$4 sm:$0xff]  }
 0x1a3   : > { %1943 = vmatprep.subr.bf16.mxu1 %v4687_v41  ;;  %v4739_v41 = vld [vmem:[#allocation11 + $0x110] ss:$8 sps:$4 sm:$0xff]   ;;  %s6316_s7 = scalar_lea.hbm %s6470_s15, %s4383_s25  ;;  %p6471_p4 = scmp.ne.s32.totalorder %s6469_s29, 0 }
 0x1a5   : > { %1462 = vmatpush1.bf16.msra.mxu0 %v4689_v42  ;;  %v4744_v42 = vld [vmem:[#allocation9 + $0x124] ss:$8 sps:$4 sm:$0xff]  }
 0x1a6   : > { %1944 = vmatpush1.bf16.msra.mxu1 %v4690_v43  ;;  %1463 = vmatprep.subr.bf16.mxu0 %v4691_v44  ;;  %v4747_v43 = vld [vmem:[#allocation11 + $0x124] ss:$8 sps:$4 sm:$0xff]   ;;  %v4742_v44 = vld [vmem:[#allocation9 + $0x120] ss:$8 sps:$4 sm:$0xff]  }
 0x1a7   : > { %1945 = vmatprep.subr.bf16.mxu1 %v4693_v45  ;;  %v4745_v45 = vld [vmem:[#allocation11 + $0x120] ss:$8 sps:$4 sm:$0xff]  }
 0x1a9   : > { %1464 = vmatpush1.bf16.msra.mxu0 %v4695_v46  ;;  %v4750_v46 = vld [vmem:[#allocation9 + $0x134] ss:$8 sps:$4 sm:$0xff]  }
 0x1aa   : > { %1946 = vmatpush1.bf16.msra.mxu1 %v4696_v47  ;;  %1465 = vmatprep.subr.bf16.mxu0 %v4697_v48  ;;  %v4753_v47 = vld [vmem:[#allocation11 + $0x134] ss:$8 sps:$4 sm:$0xff]   ;;  %v4748_v48 = vld [vmem:[#allocation9 + $0x130] ss:$8 sps:$4 sm:$0xff]  }
 0x1ab   : > { %1947 = vmatprep.subr.bf16.mxu1 %v4699_v49  ;;  %v4751_v49 = vld [vmem:[#allocation11 + $0x130] ss:$8 sps:$4 sm:$0xff]  }
 0x1ad   : > { %1466 = vmatpush1.bf16.msra.mxu0 %v4701_v50  ;;  %v4756_v50 = vld [vmem:[#allocation9 + $0x144] ss:$8 sps:$4 sm:$0xff]  }
 0x1ae   : > { %1948 = vmatpush1.bf16.msra.mxu1 %v4702_v51  ;;  %1467 = vmatprep.subr.bf16.mxu0 %v4703_v53  ;;  %v4759_v51 = vld [vmem:[#allocation11 + $0x144] ss:$8 sps:$4 sm:$0xff]   ;;  %v4757_v53 = vld [vmem:[#allocation11 + $0x140] ss:$8 sps:$4 sm:$0xff]  }
 0x1af   : > { %1949 = vmatprep.subr.bf16.mxu1 %v4705_v54  ;;  %v4762_v54 = vld [vmem:[#allocation9 + $0x154] ss:$8 sps:$4 sm:$0xff]  }
 0x1b1   : > { %1468 = vmatpush1.bf16.msra.mxu0 %v4707_v1  ;;  %v4772_v1 = vld [vmem:[#allocation9 + $0x170] ss:$8 sps:$4 sm:$0xff]  }
 0x1b2   : > { %1950 = vmatpush1.bf16.msra.mxu1 %v4708_v2  ;;  %1469 = vmatprep.subr.bf16.mxu0 %v4709_v5  ;;  %v4775_v2 = vld [vmem:[#allocation11 + $0x170] ss:$8 sps:$4 sm:$0xff]  }
 0x1b3   : > { %1951 = vmatprep.subr.bf16.mxu1 %v4711_v6  ;;  %v6094_v5 = vld [vmem:[%s6047_s11 + $0x28] sm:$0xff]  ;;  %v6097_v6 = vld [vmem:[%s6047_s11 + $0x38] sm:$0xff] }
 0x1b4   : > { %v981_v12 = vunpack.c.h.bf16 %v6094_v5  ;;  %v985_v13 = vunpack.c.h.bf16 %v6097_v6 }
 0x1b5   : > { %1470 = vmatpush1.bf16.msra.mxu0 %v4713_v15  ;;  %v989_v15 = vunpack.c.h.bf16 %v6100_v7 }
 0x1b6   : > { %1952 = vmatpush1.bf16.msra.mxu1 %v4714_v16  ;;  %1471 = vmatprep.subr.bf16.mxu0 %v4715_v17  ;;  %v993_v16 = vunpack.c.h.bf16 %v6103_v8  ;;  %v1000_v17 = vadd.f32 %v981_v12, %v973_v9  ;;  %v4841_v9 = vld [vmem:[#allocation12 + $0x40] ss:$8 sps:$4 sm:$0xff]   ;;  %v4849_v12 = vld [vmem:[#allocation12 + $0x64] ss:$8 sps:$4 sm:$0xff]  }
 0x1b7   : > { %1953 = vmatprep.subr.bf16.mxu1 %v4717_v18  ;;  %v1008_v18 = vadd.f32 %v985_v13, %v977_v10  ;;  %v4846_v10 = vld [vmem:[#allocation12 + $0x54] ss:$8 sps:$4 sm:$0xff]   ;;  %v4847_v13 = vld [vmem:[#allocation12 + $0x60] ss:$8 sps:$4 sm:$0xff]  }
 0x1b8   : > { %v1001_v22 = vadd.f32 %v1000_v17, %v989_v15  ;;  %v4850_v15 = vld [vmem:[#allocation12 + $0x70] ss:$8 sps:$4 sm:$0xff]   ;;  %v4853_v17 = vld [vmem:[#allocation12 + $0x80] ss:$8 sps:$4 sm:$0xff]  }
 0x1b9   : > { %1472 = vmatpush1.bf16.msra.mxu0 %v4719_v24  ;;  %v1009_v23 = vadd.f32 %v1008_v18, %v993_v16  ;;  %v4789_v24 = vld [vmem:[#allocation11 + $0x194] ss:$8 sps:$4 sm:$0xff]   ;;  %v4855_v16 = vld [vmem:[#allocation12 + $0x84] ss:$8 sps:$4 sm:$0xff]  }
 0x1ba   : > { %1954 = vmatpush1.bf16.msra.mxu1 %v4720_v25  ;;  %1473 = vmatprep.subr.bf16.mxu0 %v4721_v26  ;;  %v4784_v26 = vld [vmem:[#allocation9 + $0x190] ss:$8 sps:$4 sm:$0xff]   ;;  %v4858_v18 = vld [vmem:[#allocation12 + $0x94] ss:$8 sps:$4 sm:$0xff]  }
 0x1bb   : > { %1955 = vmatprep.subr.bf16.mxu1 %v4723_v27  ;;  %v1013_v25 = vpack.c.bf16 %v1009_v23, %v1001_v22  ;;  %v4787_v27 = vld [vmem:[#allocation11 + $0x190] ss:$8 sps:$4 sm:$0xff]   ;;  %v4864_v22 = vld [vmem:[#allocation12 + $0xb4] ss:$8 sps:$4 sm:$0xff]  }
 0x1bc   : > { %v4862_v23 = vld [vmem:[#allocation12 + $0xb0] ss:$8 sps:$4 sm:$0xff]  }
 0x1bd   : > { %1474 = vmatpush1.bf16.msra.mxu0 %v4725_v30  ;;  %v4790_v30 = vld [vmem:[#allocation9 + $0x1a0] ss:$8 sps:$4 sm:$0xff]  }
 0x1be   : > { %1956 = vmatpush1.bf16.msra.mxu1 %v4726_v31  ;;  %1486 = vmatprep.subr.bf16.mxu0 %v4732_v32  ;;  %v4793_v31 = vld [vmem:[#allocation11 + $0x1a0] ss:$8 sps:$4 sm:$0xff]   ;;  %v4798_v32 = vld [vmem:[#allocation9 + $0x1b4] ss:$8 sps:$4 sm:$0xff]  }
 0x1bf   : > { %1968 = vmatprep.subr.bf16.mxu1 %v4735_v33  ;;  %v4801_v33 = vld [vmem:[#allocation11 + $0x1b4] ss:$8 sps:$4 sm:$0xff]  }
 0x1c0   : > { %1476 = vmatmul.mubr.bf16.vlgmr.msra.gmra.mrb[0].mxu0 %v4727_v34  ;;  %v4796_v34 = vld [vmem:[#allocation9 + $0x1b0] ss:$8 sps:$4 sm:$0xff]  }
 0x1c1   : > { %1958 = vmatmul.mubr.bf16.vlgmr.msra.gmra.mrb[0].mxu1 %v1010_v35  ;;  %1487 = vmatpush1.bf16.msra.mxu0 %v4730_v36  ;;  %v4799_v35 = vld [vmem:[#allocation11 + $0x1b0] ss:$8 sps:$4 sm:$0xff]   ;;  %v4804_v36 = vld [vmem:[#allocation9 + $0x1c4] ss:$8 sps:$4 sm:$0xff]  }
 0x1c2   : > { %1969 = vmatpush1.bf16.msra.mxu1 %v4733_v37  ;;  %1488 = vmatprep.subr.bf16.mxu0 %v4738_v38  ;;  %v4807_v37 = vld [vmem:[#allocation11 + $0x1c4] ss:$8 sps:$4 sm:$0xff]   ;;  %v4802_v38 = vld [vmem:[#allocation9 + $0x1c0] ss:$8 sps:$4 sm:$0xff]  }
 0x1c3   : > { %1970 = vmatprep.subr.bf16.mxu1 %v4741_v39  ;;  %1518 = vmatprep.mubr.bf16.mxu0 %v4828_v0  ;;  %v4805_v39 = vld [vmem:[#allocation11 + $0x1c0] ss:$8 sps:$4 sm:$0xff]  }
 0x1c4   : > { %2000 = vmatprep.mubr.bf16.mxu1 %v1013_v25  ;;  %v4829_v0 = vld [vmem:[#allocation12] ss:$8 sps:$4 sm:$0xff]  }
 0x1c5   : > { %1489 = vmatpush1.bf16.msra.mxu0 %v4736_v40  ;;  %v4810_v40 = vld [vmem:[#allocation9 + $0x1d4] ss:$8 sps:$4 sm:$0xff]   ;;  %v4865_v25 = vld [vmem:[#allocation12 + $0xc0] ss:$8 sps:$4 sm:$0xff]  }
 0x1c6   : > { %1971 = vmatpush1.bf16.msra.mxu1 %v4739_v41  ;;  %1490 = vmatprep.subr.bf16.mxu0 %v4744_v42  ;;  %v4813_v41 = vld [vmem:[#allocation11 + $0x1d4] ss:$8 sps:$4 sm:$0xff]   ;;  %v4808_v42 = vld [vmem:[#allocation9 + $0x1d0] ss:$8 sps:$4 sm:$0xff]  }
 0x1c7   : > { %1972 = vmatprep.subr.bf16.mxu1 %v4747_v43  ;;  %v4811_v43 = vld [vmem:[#allocation11 + $0x1d0] ss:$8 sps:$4 sm:$0xff]  }
 0x1c9   : > { %1491 = vmatpush1.bf16.msra.mxu0 %v4742_v44  ;;  %v4816_v44 = vld [vmem:[#allocation9 + $0x1e4] ss:$8 sps:$4 sm:$0xff]  }
 0x1ca   : > { %1973 = vmatpush1.bf16.msra.mxu1 %v4745_v45  ;;  %1492 = vmatprep.subr.bf16.mxu0 %v4750_v46  ;;  %v4819_v45 = vld [vmem:[#allocation11 + $0x1e4] ss:$8 sps:$4 sm:$0xff]   ;;  %v972_v46 = vunpack.c.l.bf16 %v6088_v3  ;;  %v4832_v3 = vld [vmem:[#allocation12 + $0x10] ss:$8 sps:$4 sm:$0xff]  }
 0x1cb   : > { %1974 = vmatprep.subr.bf16.mxu1 %v4753_v47  ;;  %v976_v47 = vunpack.c.l.bf16 %v6091_v4  ;;  %v4837_v4 = vld [vmem:[#allocation12 + $0x24] ss:$8 sps:$4 sm:$0xff]  }
 0x1cd   : > { %1493 = vmatpush1.bf16.msra.mxu0 %v4748_v48  ;;  %v980_v48 = vunpack.c.l.bf16 %v6094_v5  ;;  %v4835_v5 = vld [vmem:[#allocation12 + $0x20] ss:$8 sps:$4 sm:$0xff]  }
 0x1ce   : > { %1975 = vmatpush1.bf16.msra.mxu1 %v4751_v49  ;;  %1494 = vmatprep.subr.bf16.mxu0 %v4756_v50  ;;  %v984_v49 = vunpack.c.l.bf16 %v6097_v6  ;;  %v4814_v50 = vld [vmem:[#allocation9 + $0x1e0] ss:$8 sps:$4 sm:$0xff]   ;;  %v4840_v6 = vld [vmem:[#allocation12 + $0x34] ss:$8 sps:$4 sm:$0xff]  }
 0x1cf   : > { %1976 = vmatprep.subr.bf16.mxu1 %v4759_v51  ;;  %v4817_v51 = vld [vmem:[#allocation11 + $0x1e0] ss:$8 sps:$4 sm:$0xff]  }
 0x1d1   : > { %1495 = vmatpush1.bf16.msra.mxu0 %v4754_v52  ;;  %v4822_v52 = vld [vmem:[#allocation9 + $0x1f4] ss:$8 sps:$4 sm:$0xff]  }
 0x1d2   : > { %1977 = vmatpush1.bf16.msra.mxu1 %v4757_v53  ;;  %1496 = vmatprep.subr.bf16.mxu0 %v4762_v54  ;;  %v4825_v53 = vld [vmem:[#allocation11 + $0x1f4] ss:$8 sps:$4 sm:$0xff]   ;;  %v988_v54 = vunpack.c.l.bf16 %v6100_v7  ;;  %v4838_v7 = vld [vmem:[#allocation12 + $0x30] ss:$8 sps:$4 sm:$0xff]  }
 0x1d3   : > { %1978 = vmatprep.subr.bf16.mxu1 %v4765_v55  ;;  %v992_v55 = vunpack.c.l.bf16 %v6103_v8  ;;  %v4843_v8 = vld [vmem:[#allocation12 + $0x44] ss:$8 sps:$4 sm:$0xff]  }
 0x1d5   : > { %1497 = vmatpush1.bf16.msra.mxu0 %v4760_v56  ;;  %v998_v56 = vadd.f32 %v980_v48, %v972_v46  ;;  %v5523_v46 = vmov 0   ;;  %v1019_v48 = vld [vmem:[%s6056_s28 + $0x18] sm:$0xff] }
 0x1d6   : > { %1979 = vmatpush1.bf16.msra.mxu1 %v4763_v57  ;;  %1498 = vmatprep.subr.bf16.mxu0 %v4768_v58  ;;  %v1006_v57 = vadd.f32 %v984_v49, %v976_v47  ;;  %v4820_v58 = vld [vmem:[#allocation9 + $0x1f0] ss:$8 sps:$4 sm:$0xff]   ;;  %v1017_v47 = vld [vmem:[%s6056_s28 + $0x8] sm:$0xff] }
 0x1d7   : > { %1980 = vmatprep.subr.bf16.mxu1 %v4771_v59  ;;  %v4823_v59 = vld [vmem:[#allocation11 + $0x1f0] ss:$8 sps:$4 sm:$0xff]   ;;  %4623 = vset.pattern.permute.xlu0 %v5523_v46  ;;  %v1024_v49 = vsel %vm1020_vm3, %v1017_v47, 0.0  ;;  %v4909_v47 = vld [vmem:[#allocation12 + $0x1a4] ss:$8 sps:$4 sm:$0xff]  }
 0x1d8   : > { %4624 = vset.pattern.permute.xlu1 %v5523_v46 }
 0x1d9   : > { %1499 = vmatpush1.bf16.msra.mxu0 %v4766_v60  ;;  %v999_v60 = vadd.f32 %v998_v56, %v988_v54  ;;  %v4952_v54 = vld [vmem:[#allocation17 + $0x48] sm:$0xff]   ;;  %v4954_v56 = vld [vmem:[#allocation17 + $0x50] sm:$0xff]  }
 0x1da   : > { %1981 = vmatpush1.bf16.msra.mxu1 %v4769_v61  ;;  %1500 = vmatprep.subr.bf16.mxu0 %v4774_v62  ;;  %v1007_v61 = vadd.f32 %v1006_v57, %v992_v55  ;;  %v4831_v62 = vld [vmem:[#allocation12 + $0x4] ss:$8 sps:$4 sm:$0xff]   ;;  %v4955_v57 = vld [vmem:[#allocation17 + $0x10] sm:$0xff]  }
 0x1db   : > { %1982 = vmatprep.subr.bf16.mxu1 %v4777_v63  ;;  %v4826_v63 = vld [vmem:[%s6039_s26 + $0x8] ss:$16 sps:$4 sm:$0xff]   ;;  %s5406_s26 = sshll.u32 %s5527_s2, 4  ;;  %s5407_s26 = int_to_ptr.vmem [resolvable:$false] %s5406_s26 }
 0x1dc   : > { %v4953_v55 = vld [vmem:[#allocation17 + $0x8] sm:$0xff]   ;;  %s5408_s3 = scalar_lea.vmem %s5407_s26, 512 }
 0x1dd   : > { %1501 = vmatpush1.bf16.msra.mxu0 %v4772_v1  ;;  %v1012_v1 = vpack.c.bf16 %v1007_v61, %v999_v60  ;;  %v4957_v60 = vld [vmem:[#allocation17 + $0x18] sm:$0xff]   ;;  %v4958_v61 = vld [vmem:[#allocation17 + $0x60] sm:$0xff]  }
 0x1de   : > { %1983 = vmatpush1.bf16.msra.mxu1 %v4775_v2  ;;  %1502 = vmatprep.subr.bf16.mxu0 %v4780_v11  ;;  %v4834_v2 = vld [vmem:[#allocation12 + $0x14] ss:$8 sps:$4 sm:$0xff]   ;;  %v4844_v11 = vld [vmem:[#allocation12 + $0x50] ss:$8 sps:$4 sm:$0xff]  }
 0x1df   : > { %1984 = vmatprep.subr.bf16.mxu1 %v4783_v14  ;;  %v4852_v14 = vld [vmem:[#allocation12 + $0x74] ss:$8 sps:$4 sm:$0xff]  }
 0x1e1   : > { %1503 = vmatpush1.bf16.msra.mxu0 %v4778_v19  ;;  %v4856_v19 = vld [vmem:[#allocation12 + $0x90] ss:$8 sps:$4 sm:$0xff]  }
 0x1e2   : > { %1985 = vmatpush1.bf16.msra.mxu1 %v4781_v20  ;;  %1504 = vmatprep.subr.bf16.mxu0 %v4786_v21  ;;  %v4861_v20 = vld [vmem:[#allocation12 + $0xa4] ss:$8 sps:$4 sm:$0xff]   ;;  %v4859_v21 = vld [vmem:[#allocation12 + $0xa0] ss:$8 sps:$4 sm:$0xff]  }
 0x1e3   : > { %1986 = vmatprep.subr.bf16.mxu1 %v4789_v24  ;;  %v4867_v24 = vld [vmem:[#allocation12 + $0xc4] ss:$8 sps:$4 sm:$0xff]  }
 0x1e5   : > { %1505 = vmatpush1.bf16.msra.mxu0 %v4784_v26  ;;  %v4870_v26 = vld [vmem:[#allocation12 + $0xd4] ss:$8 sps:$4 sm:$0xff]  }
 0x1e6   : > { %1987 = vmatpush1.bf16.msra.mxu1 %v4787_v27  ;;  %1506 = vmatprep.subr.bf16.mxu0 %v4792_v28  ;;  %v4868_v27 = vld [vmem:[#allocation12 + $0xd0] ss:$8 sps:$4 sm:$0xff]   ;;  %v4873_v28 = vld [vmem:[#allocation12 + $0xe4] ss:$8 sps:$4 sm:$0xff]  }
 0x1e7   : > { %1988 = vmatprep.subr.bf16.mxu1 %v4795_v29  ;;  %v4871_v29 = vld [vmem:[#allocation12 + $0xe0] ss:$8 sps:$4 sm:$0xff]  }
 0x1e9   : > { %1507 = vmatpush1.bf16.msra.mxu0 %v4790_v30  ;;  %v4876_v30 = vld [vmem:[#allocation12 + $0xf4] ss:$8 sps:$4 sm:$0xff]  }
 0x1ea   : > { %1989 = vmatpush1.bf16.msra.mxu1 %v4793_v31  ;;  %1508 = vmatprep.subr.bf16.mxu0 %v4798_v32  ;;  %v4874_v31 = vld [vmem:[#allocation12 + $0xf0] ss:$8 sps:$4 sm:$0xff]   ;;  %v4879_v32 = vld [vmem:[#allocation12 + $0x104] ss:$8 sps:$4 sm:$0xff]  }
 0x1eb   : > { %1990 = vmatprep.subr.bf16.mxu1 %v4801_v33  ;;  %v2655_v33 = vld [vmem:[#allocation15 + $0x8] sm:$0xff] }
 0x1ed   : > { %1509 = vmatpush1.bf16.msra.mxu0 %v4796_v34  ;;  %v2657_v34 = vld [vmem:[#allocation15 + $0x18] sm:$0x1] }
 0x1ee   : > { %1991 = vmatpush1.bf16.msra.mxu1 %v4799_v35  ;;  %1510 = vmatprep.subr.bf16.mxu0 %v4804_v36  ;;  %v4406_v35 = vpack.c.bf16 %v2657_v34, %v2655_v33  ;;  %v4894_v33 = vld [vmem:[#allocation12 + $0x154] ss:$8 sps:$4 sm:$0xff]   ;;  %v4892_v34 = vld [vmem:[#allocation12 + $0x150] ss:$8 sps:$4 sm:$0xff]  }
 0x1ef   : > { %1992 = vmatprep.subr.bf16.mxu1 %v4807_v37  ;;  %v2654_v37 = vld [vmem:[#allocation15] sm:$0xff] }
 0x1f1   : > { %1511 = vmatpush1.bf16.msra.mxu0 %v4802_v38  ;;  %v2656_v38 = vld [vmem:[#allocation15 + $0x10] sm:$0x1] }
 0x1f2   : > { %1993 = vmatpush1.bf16.msra.mxu1 %v4805_v39  ;;  %1512 = vmatprep.subr.bf16.mxu0 %v4810_v40  ;;  %v4409_v39 = vpack.c.bf16 %v2656_v38, %v2654_v37  ;;  %v1016_v40 = vld [vmem:[%s6056_s28] sm:$0xff]  ;;  %v4900_v38 = vld [vmem:[#allocation12 + $0x174] ss:$8 sps:$4 sm:$0xff]  }
 0x1f3   : > { %1994 = vmatprep.subr.bf16.mxu1 %v4813_v41  ;;  %v1018_v41 = vld [vmem:[%s6056_s28 + $0x10] sm:$0xff]  ;;  %v4895_v37 = vld [vmem:[#allocation12 + $0x160] ss:$8 sps:$4 sm:$0xff]   ;;  %s4047_s28 = sshll.u32 %s6035_s4, 4 }
 0x1f5   : > { %1513 = vmatpush1.bf16.msra.mxu0 %v4808_v42  ;;  %v1021_v42 = vsel %vm1020_vm3, %v1016_v40, 0.0  ;;  %v4903_v40 = vld [vmem:[#allocation12 + $0x184] ss:$8 sps:$4 sm:$0xff]  }
 0x1f6   : > { %1995 = vmatpush1.bf16.msra.mxu1 %v4811_v43  ;;  %1514 = vmatprep.subr.bf16.mxu0 %v4816_v44  ;;  %v1022_v43 = vsel %vm1020_vm3, %v1018_v41, 0.0  ;;  %v4901_v41 = vld [vmem:[#allocation12 + $0x180] ss:$8 sps:$4 sm:$0xff]  }
 0x1f7   : > { %1996 = vmatprep.subr.bf16.mxu1 %v4819_v45  ;;  %v6130_v44 = vadd.f32 %v1022_v43, %v1021_v42  ;;  %v5522_v45 = vmov 0.0   ;;  %v4906_v42 = vld [vmem:[#allocation12 + $0x194] ss:$8 sps:$4 sm:$0xff]   ;;  %v4904_v43 = vld [vmem:[#allocation12 + $0x190] ss:$8 sps:$4 sm:$0xff]  }
 0x1f9   : > { %1515 = vmatpush1.bf16.msra.mxu0 %v4814_v50  ;;  %v1025_v50 = vsel %vm1020_vm3, %v1019_v48, 0.0  ;;  %v4907_v48 = vld [vmem:[#allocation12 + $0x1a0] ss:$8 sps:$4 sm:$0xff]  }
 0x1fa   : > { %1997 = vmatpush1.bf16.msra.mxu1 %v4817_v51  ;;  %1516 = vmatprep.subr.bf16.mxu0 %v4822_v52  ;;  %v4950_v51 = vld [vmem:[#allocation17 + $0x40] sm:$0xff]  }
 0x1fb   : > { %1998 = vmatprep.subr.bf16.mxu1 %v4825_v53  ;;  %v4951_v52 = vld [vmem:[#allocation17] sm:$0xff]   ;;  %v6142_v53 = vadd.f32 %v1025_v50, %v1024_v49  ;;  %v4912_v49 = vld [vmem:[#allocation12 + $0x1b4] ss:$8 sps:$4 sm:$0xff]   ;;  %v4910_v50 = vld [vmem:[#allocation12 + $0x1b0] ss:$8 sps:$4 sm:$0xff]  }
 0x1fd   : > { %1517 = vmatpush1.bf16.msra.mxu0 %v4820_v58  ;;  %v4956_v58 = vld [vmem:[#allocation17 + $0x58] sm:$0xff]  }
 0x1fe   : > { %1999 = vmatpush1.bf16.msra.mxu1 %v4823_v59  ;;  %2208 = vmatprep.subr.bf16.mxu0 %v4831_v62  ;;  %v1093_v59 = vlaneseq }
 0x1ff   : > { %4408 = vmatprep.subr.msk.bf16.mxu1 %vm6118_vm2, %v4406_v35  ;;  %v4897_v35 = vld [vmem:[#allocation12 + $0x164] ss:$8 sps:$4 sm:$0xff]  }
 0x200   : > { %1519 = vmatmul.mubr.bf16.vlgmr.msra.gmra.mrb[0].mxu0 %v4826_v63  ;;  %v1094_v62 = vshrl.u32 %v1093_v59, 7  ;;  %v4959_v63 = vld [vmem:[#allocation17 + $0x20] sm:$0xff]   ;;  %v4924_v59 = vld [vmem:[#allocation12 + $0x1f4] ss:$8 sps:$4 sm:$0xff]  }
 0x201   : > { %2001 = vmatmul.mubr.bf16.vlgmr.msra.gmra.mrb[0].mxu1 %v1012_v1  ;;  %2209 = vmatpush1.bf16.msra.mxu0 %v4829_v0  ;;  %v1091_v1 = vld [vmem:[%s6462_s20] sm:$0x3]  ;;  %s947_s20 = scalar_lea.vmem [#allocation23], %s4047_s28 }
 0x202   : > { %2210 = vmatprep.subr.bf16.mxu0 %v4834_v2  ;;  %4411 = vmatpush1.bf16.msk.msra.mxu1 %vm6118_vm2, %v4409_v39  ;;  %v6146_v0 = vsub.s32 1, %v1094_v62  ;;  %v6151_v2 = vsub.s32 0, %v1094_v62  ;;  %v4898_v39 = vld [vmem:[#allocation12 + $0x170] ss:$8 sps:$4 sm:$0xff]   ;;  %s3787_s6 = sshll.u32 %s947_s20, 4  ;;  %s6318_s6 = int_to_ptr.vmem [resolvable:$true] %s3787_s6 }
 0x203   : > { %2735 = vmatprep.mubr.f32.mxu1 %v5522_v45  ;;  %4384 = vmatprep.subr.bf16.mxu1 %v4950_v51  ;;  %v4915_v51 = vld [vmem:[#allocation12 + $0x1c4] ss:$8 sps:$4 sm:$0xff]   ;;  %p5409_p10 = scmp.lt.s32.totalorder %s6318_s6, %s5407_s26 }
 0x205   : > { %2211 = vmatpush1.bf16.msra.mxu0 %v4832_v3  ;;  %v6156_v3 = vld [vmem:[%s6463_s16] sm:$0x3] }
 0x206   : > { %2212 = vmatprep.subr.bf16.mxu0 %v4837_v4 }
 0x209   : > { %2213 = vmatpush1.bf16.msra.mxu0 %v4835_v5  ;;  %4263 = vmatmul.mubr.msk.f32.vlgmr.msra.gmra.mrb[4].mxu1 %vm1020_vm3, %v6130_v44 }
 0x20a   : > { %2214 = vmatprep.subr.bf16.mxu0 %v4840_v6  ;;  %2741 = vmatprep.mubr.f32.mxu1 %v5522_v45  ;;  %v1100_v6 = vrot.slane %v1091_v1, %v6146_v0 }
 0x20b   : > { %4385 = vmatpush3.bf16.msra.mxu1 %v4951_v52  ;;  %v4913_v52 = vld [vmem:[#allocation12 + $0x1c0] ss:$8 sps:$4 sm:$0xff]  }
 0x20c   : > { %4386 = vmatprep.subr.bf16.mxu1 %v4952_v54  ;;  %v4918_v54 = vld [vmem:[#allocation12 + $0x1d4] ss:$8 sps:$4 sm:$0xff]  }
 0x20d   : > { %2215 = vmatpush1.bf16.msra.mxu0 %v4838_v7  ;;  %4264 = vmatmul.mubr.msk.f32.gmra.mrb[6].mxu1 %vm1020_vm3, %v6142_v53  ;;  %v1096_v7 = vrot.slane %v1091_v1, %v6151_v2  ;;  %v4925_v1 = vld [vmem:[#allocation14] ss:$8 sps:$4 sm:$0xff]  }
 0x20e   : > { %2216 = vmatprep.subr.bf16.mxu0 %v4843_v8 }
 0x20f   : > { %4387 = vmatpush3.bf16.msra.mxu1 %v4953_v55  ;;  %v4916_v55 = vld [vmem:[#allocation12 + $0x1d0] ss:$8 sps:$4 sm:$0xff]  }
 0x210   : > { %4388 = vmatprep.subr.bf16.mxu1 %v4954_v56  ;;  %v4921_v56 = vld [vmem:[#allocation12 + $0x1e4] ss:$8 sps:$4 sm:$0xff]  }
 0x211   : > { %2217 = vmatpush1.bf16.msra.mxu0 %v4841_v9 }
 0x212   : > { %2218 = vmatprep.subr.bf16.mxu0 %v4846_v10  ;;  %v1602_v10 = vrot.slane %v6156_v3, %v6146_v0 }
 0x213   : > { %4389 = vmatpush3.bf16.msra.mxu1 %v4955_v57  ;;  %v4919_v57 = vld [vmem:[#allocation12 + $0x1e0] ss:$8 sps:$4 sm:$0xff]  }
 0x214   : > { %4390 = vmatprep.subr.bf16.mxu1 %v4956_v58  ;;  %v1598_v58 = vrot.slane %v6156_v3, %v6151_v2  ;;  %v4928_v3 = vld [vmem:[#allocation14 + $0x10] ss:$8 sps:$4 sm:$0xff]  }
 0x215   : > { %2219 = vmatpush1.bf16.msra.mxu0 %v4844_v11 }
 0x216   : > { %2220 = vmatprep.subr.bf16.mxu0 %v4849_v12 }
 0x217   : > { %4391 = vmatpush3.bf16.msra.mxu1 %v4957_v60  ;;  %v4922_v60 = vld [vmem:[#allocation12 + $0x1f0] ss:$8 sps:$4 sm:$0xff]  }
 0x218   : > { %4392 = vmatprep.subr.bf16.mxu1 %v4958_v61 }
 0x219   : > { %2221 = vmatpush1.bf16.msra.mxu0 %v4847_v13 }
 0x21a   : > { %2222 = vmatprep.subr.bf16.mxu0 %v4852_v14 }
 0x21b   : > { %4393 = vmatpush3.bf16.msra.mxu1 %v4959_v63  ;;  %v4927_v63 = vld [vmem:[#allocation14 + $0x4] ss:$8 sps:$4 sm:$0xff]  }
 0x21d   : > { %2223 = vmatpush1.bf16.msra.mxu0 %v4850_v15 }
 0x21e   : > { %2224 = vmatprep.subr.bf16.mxu0 %v4855_v16 }
 0x221   : > { %2225 = vmatpush1.bf16.msra.mxu0 %v4853_v17 }
 0x222   : > { %2226 = vmatprep.subr.bf16.mxu0 %v4858_v18 }
 0x225   : > { %2227 = vmatpush1.bf16.msra.mxu0 %v4856_v19 }
 0x226   : > { %2228 = vmatprep.subr.bf16.mxu0 %v4861_v20 }
 0x229   : > { %2229 = vmatpush1.bf16.msra.mxu0 %v4859_v21 }
 0x22a   : > { %2230 = vmatprep.subr.bf16.mxu0 %v4864_v22  ;;  %v4877_v22 = vld [vmem:[#allocation12 + $0x100] ss:$8 sps:$4 sm:$0xff]  }
 0x22d   : > { %2231 = vmatpush1.bf16.msra.mxu0 %v4862_v23 }
 0x22e   : > { %2232 = vmatprep.subr.bf16.mxu0 %v4867_v24  ;;  %v4882_v24 = vld [vmem:[#allocation12 + $0x114] ss:$8 sps:$4 sm:$0xff]  }
 0x231   : > { %2233 = vmatpush1.bf16.msra.mxu0 %v4865_v25 }
 0x232   : > { %2234 = vmatprep.subr.bf16.mxu0 %v4870_v26  ;;  %v4880_v26 = vld [vmem:[#allocation12 + $0x110] ss:$8 sps:$4 sm:$0xff]  }
 0x235   : > { %2235 = vmatpush1.bf16.msra.mxu0 %v4868_v27  ;;  %v4885_v27 = vld [vmem:[#allocation12 + $0x124] ss:$8 sps:$4 sm:$0xff]  }
 0x236   : > { %2236 = vmatprep.subr.bf16.mxu0 %v4873_v28  ;;  %v4883_v28 = vld [vmem:[#allocation12 + $0x120] ss:$8 sps:$4 sm:$0xff]  }
 0x239   : > { %2237 = vmatpush1.bf16.msra.mxu0 %v4871_v29  ;;  %v4888_v29 = vld [vmem:[#allocation12 + $0x134] ss:$8 sps:$4 sm:$0xff]  }
 0x23a   : > { %2238 = vmatprep.subr.bf16.mxu0 %v4876_v30  ;;  %v4886_v30 = vld [vmem:[#allocation12 + $0x130] ss:$8 sps:$4 sm:$0xff]  }
 0x23d   : > { %2239 = vmatpush1.bf16.msra.mxu0 %v4874_v31  ;;  %v4891_v31 = vld [vmem:[#allocation12 + $0x144] ss:$8 sps:$4 sm:$0xff]  }
 0x23e   : > { %2458 = vmatprep.subr.bf16.mxu0 %v4879_v32  ;;  %v4889_v32 = vld [vmem:[#allocation12 + $0x140] ss:$8 sps:$4 sm:$0xff]  }
 0x2d3   : > { %v1520_v4 = vpop.f32.mrb[0].mxu0 }
 0x2d4   : > { %v6158_v5 = vpop.f32.mrb[0].mxu1  ;;  %v1522_v8 = vpop.f32.mrb[1].mxu0  ;;  %v6174_v19 = vadd.f32 %v1520_v4, %v1096_v7 }
 0x2d5   : > { %v2004_v9 = vpop.f32.mrb[1].mxu1  ;;  %v1524_v11 = vpop.f32.mrb[2].mxu0  ;;  %v6168_v16 = vadd.f32 %v1522_v8, %v1100_v6  ;;  %v6187_v61 = vadd.f32 %v6158_v5, %v1598_v58  ;;  %v4933_v5 = vld [vmem:[#allocation14 + $0x24] ss:$8 sps:$4 sm:$0xff]   ;;  %v4936_v8 = vld [vmem:[#allocation14 + $0x34] ss:$8 sps:$4 sm:$0xff]  }
 0x2d6   : > { %v6164_v12 = vpop.f32.mrb[2].mxu1  ;;  %v6166_v13 = vadd.f32 %v1524_v11, %v1096_v7  ;;  %v1526_v14 = vpop.f32.mrb[3].mxu0  ;;  %v6176_v20 = vadd.f32 %v2004_v9, %v1602_v10  ;;  %v4931_v7 = vld [vmem:[#allocation14 + $0x20] ss:$8 sps:$4 sm:$0xff]   ;;  %v4934_v9 = vld [vmem:[#allocation14 + $0x30] ss:$8 sps:$4 sm:$0xff]  }
 0x2d7   : > { %v2008_v15 = vpop.f32.mrb[3].mxu1  ;;  %v6170_v17 = vadd.f32 %v1526_v14, %v1100_v6  ;;  %v6190_v62 = vadd.f32 %v6164_v12, %v1598_v58  ;;  %v4930_v6 = vld [vmem:[#allocation14 + $0x14] ss:$8 sps:$4 sm:$0xff]   ;;  %v4937_v11 = vld [vmem:[#allocation14 + $0x40] ss:$8 sps:$4 sm:$0xff]  }
 0x2d8   : > { %v6172_v18 = vadd.f32 %v2008_v15, %v1602_v10  ;;  %v2011_v23 = vpack.c.bf16 %v6166_v13, %v6174_v19  ;;  %v4939_v10 = vld [vmem:[#allocation14 + $0x44] ss:$8 sps:$4 sm:$0xff]   ;;  %v4942_v12 = vld [vmem:[#allocation14 + $0x54] ss:$8 sps:$4 sm:$0xff]   ;;  %v4940_v14 = vld [vmem:[#allocation14 + $0x50] ss:$8 sps:$4 sm:$0xff]  }
 0x2d9   : > { %v2012_v21 = vpack.c.bf16 %v6170_v17, %v6168_v16  ;;  %v2013_v4 = vpack.c.bf16 %v6190_v62, %v6187_v61  ;;  %v4945_v15 = vld [vmem:[#allocation14 + $0x64] ss:$8 sps:$4 sm:$0xff]  }
 0x2da   : > { %v2014_v25 = vpack.c.bf16 %v6172_v18, %v6176_v20 }
 0x2db   : > { %2240 = vmatprep.mubr.bf16.mxu0 %v2012_v21  ;;  %v4943_v21 = vld [vmem:[#allocation14 + $0x60] ss:$8 sps:$4 sm:$0xff]  }
 0x2dc   : > { %2241 = vmatmul.mubr.bf16.vlgmr.msra.gmra.mrb[4].mxu0 %v2011_v23  ;;  %v4946_v23 = vld [vmem:[#allocation14 + $0x70] ss:$8 sps:$4 sm:$0xff]  }
 0x2dd   : > { %2459 = vmatpush1.bf16.msra.mxu0 %v4877_v22  ;;  %2490 = vmatprep.mubr.bf16.mxu0 %v2014_v25  ;;  %v4948_v22 = vld [vmem:[#allocation14 + $0x74] ss:$8 sps:$4 sm:$0xff]   ;;  %v2737_v25 = vpop.f32.mrb[4].mxu1 }
 0x2de   : > { %2460 = vmatprep.subr.bf16.mxu0 %v4882_v24  ;;  %v6196_v24 = vld [vmem:[%s6054_s1] sm:$0xff]   ;;  %s6468_s1 = sld [smem:[#allocation52_spill]] }
 0x2e1   : > { %2461 = vmatpush1.bf16.msra.mxu0 %v4880_v26  ;;  %v4960_v26 = vld [vmem:[#allocation17 + $0x68] sm:$0xff]  }
 0x2e2   : > { %2462 = vmatprep.subr.bf16.mxu0 %v4885_v27  ;;  %v2739_v27 = vpop.f32.mrb[5].mxu1  ;;  %4394 = vmatprep.subr.bf16.mxu1 %v4960_v26  ;;  %v4983_v26 = vld [vmem:[%s6465_s21 + $0x54] ss:$8 sps:$4 sm:$0xff]  }
 0x2e5   : > { %2463 = vmatpush1.bf16.msra.mxu0 %v4883_v28  ;;  %v4961_v28 = vld [vmem:[#allocation17 + $0x28] sm:$0xff]  }
 0x2e6   : > { %2464 = vmatprep.subr.bf16.mxu0 %v4888_v29  ;;  %4395 = vmatpush3.bf16.msra.mxu1 %v4961_v28  ;;  %v2743_v29 = vpop.f32.mrb[6].mxu1  ;;  %v4986_v28 = vld [vmem:[%s6465_s21 + $0x64] ss:$8 sps:$4 sm:$0xff]  }
 0x2e9   : > { %2465 = vmatpush1.bf16.msra.mxu0 %v4886_v30  ;;  %v4962_v30 = vld [vmem:[#allocation17 + $0x70] sm:$0xff]  }
 0x2ea   : > { %2466 = vmatprep.subr.bf16.mxu0 %v4891_v31  ;;  %v2745_v31 = vpop.f32.mrb[7].mxu1  ;;  %4396 = vmatprep.subr.bf16.mxu1 %v4962_v30  ;;  %v4989_v30 = vld [vmem:[%s6465_s21 + $0x74] ss:$8 sps:$4 sm:$0xff]  }
 0x2ed   : > { %2467 = vmatpush1.bf16.msra.mxu0 %v4889_v32  ;;  %v4963_v32 = vld [vmem:[#allocation17 + $0x30] sm:$0xff]  }
 0x2ee   : > { %2468 = vmatprep.subr.bf16.mxu0 %v4894_v33  ;;  %4397 = vmatpush3.bf16.msra.mxu1 %v4963_v32  ;;  %v4964_v33 = vld [vmem:[#allocation17 + $0x78] sm:$0xff]  }
 0x2ef   : > { %4398 = vmatprep.subr.bf16.mxu1 %v4964_v33 }
 0x2f1   : > { %2469 = vmatpush1.bf16.msra.mxu0 %v4892_v34  ;;  %v4965_v34 = vld [vmem:[#allocation17 + $0x38] sm:$0xff]  }
 0x2f2   : > { %2470 = vmatprep.subr.bf16.mxu0 %v4897_v35  ;;  %4399 = vmatpush3.bf16.msra.mxu1 %v4965_v34 }
 0x2f5   : > { %2471 = vmatpush1.bf16.msra.mxu0 %v4895_v37 }
 0x2f6   : > { %2472 = vmatprep.subr.bf16.mxu0 %v4900_v38 }
 0x2f9   : > { %2473 = vmatpush1.bf16.msra.mxu0 %v4898_v39 }
 0x2fa   : > { %2474 = vmatprep.subr.bf16.mxu0 %v4903_v40 }
 0x2fd   : > { %2475 = vmatpush1.bf16.msra.mxu0 %v4901_v41 }
 0x2fe   : > { %2476 = vmatprep.subr.bf16.mxu0 %v4906_v42 }
 0x301   : > { %2477 = vmatpush1.bf16.msra.mxu0 %v4904_v43 }
 0x302   : > { %2478 = vmatprep.subr.bf16.mxu0 %v4909_v47 }
 0x305   : > { %2479 = vmatpush1.bf16.msra.mxu0 %v4907_v48 }
 0x306   : > { %2480 = vmatprep.subr.bf16.mxu0 %v4912_v49 }
 0x309   : > { %2481 = vmatpush1.bf16.msra.mxu0 %v4910_v50 }
 0x30a   : > { %2482 = vmatprep.subr.bf16.mxu0 %v4915_v51 }
 0x30d   : > { %2483 = vmatpush1.bf16.msra.mxu0 %v4913_v52 }
 0x30e   : > { %2484 = vmatprep.subr.bf16.mxu0 %v4918_v54 }
 0x311   : > { %2485 = vmatpush1.bf16.msra.mxu0 %v4916_v55 }
 0x312   : > { %2486 = vmatprep.subr.bf16.mxu0 %v4921_v56 }
 0x315   : > { %2487 = vmatpush1.bf16.msra.mxu0 %v4919_v57 }
 0x316   : > { %2488 = vmatprep.subr.bf16.mxu0 %v4924_v59 }
 0x319   : > { %2489 = vmatpush1.bf16.msra.mxu0 %v4922_v60 }
 0x31a   : > { %2607 = vmatprep.subr.bf16.mxu0 %v4927_v63 }
 0x31c   : > { %2491 = vmatmul.mubr.bf16.vlgmr.msra.gmra.mrb[4].mxu0 %v2013_v4 }
 0x31d   : > { %2608 = vmatpush1.bf16.msra.mxu0 %v4925_v1  ;;  %2639 = vmatprep.mubr.bf16.mxu0 %v5523_v46  ;;  %v4265_v1 = vld [vmem:[#allocation18] ss:$0 sm:$0xff] }
 0x31e   : > { %2609 = vmatprep.subr.bf16.mxu0 %v4930_v6 }
 0x321   : > { %2610 = vmatpush1.bf16.msra.mxu0 %v4928_v3 }
 0x322   : > { %2611 = vmatprep.subr.bf16.mxu0 %v4933_v5 }
 0x325   : > { %2612 = vmatpush1.bf16.msra.mxu0 %v4931_v7 }
 0x326   : > { %2613 = vmatprep.subr.bf16.mxu0 %v4936_v8 }
 0x329   : > { %2614 = vmatpush1.bf16.msra.mxu0 %v4934_v9  ;;  %v4966_v9 = vld [vmem:[%s6465_s21] ss:$8 sps:$4 sm:$0xff]  }
 0x32a   : > { %2615 = vmatprep.subr.bf16.mxu0 %v4939_v10  ;;  %v4968_v10 = vld [vmem:[%s6465_s21 + $0x4] ss:$8 sps:$4 sm:$0xff]  }
 0x32d   : > { %2616 = vmatpush1.bf16.msra.mxu0 %v4937_v11  ;;  %v4971_v11 = vld [vmem:[%s6465_s21 + $0x14] ss:$8 sps:$4 sm:$0xff]  }
 0x32e   : > { %2617 = vmatprep.subr.bf16.mxu0 %v4942_v12  ;;  %v4969_v12 = vld [vmem:[%s6465_s21 + $0x10] ss:$8 sps:$4 sm:$0xff]  }
 0x331   : > { %2618 = vmatpush1.bf16.msra.mxu0 %v4940_v14  ;;  %v4974_v14 = vld [vmem:[%s6465_s21 + $0x24] ss:$8 sps:$4 sm:$0xff]  }
 0x332   : > { %2619 = vmatprep.subr.bf16.mxu0 %v4945_v15  ;;  %v4972_v15 = vld [vmem:[%s6465_s21 + $0x20] ss:$8 sps:$4 sm:$0xff]  }
 0x335   : > { %2620 = vmatpush1.bf16.msra.mxu0 %v4943_v21  ;;  %v4977_v21 = vld [vmem:[%s6465_s21 + $0x34] ss:$8 sps:$4 sm:$0xff]  }
 0x336   : > { %2621 = vmatprep.subr.bf16.mxu0 %v4948_v22  ;;  %v4975_v22 = vld [vmem:[%s6465_s21 + $0x30] ss:$8 sps:$4 sm:$0xff]  }
 0x339   : > { %2622 = vmatpush1.bf16.msra.mxu0 %v4946_v23  ;;  %v4980_v23 = vld [vmem:[%s6465_s21 + $0x44] ss:$8 sps:$4 sm:$0xff]  }
 0x33a   : > { %3580 = vmatprep.subr.bf16.mxu0 %v4968_v10  ;;  %v5029_v10 = vld [vmem:[#allocation20 + $0xd0] ss:$8 sps:$4 sm:$0xff]  }
 0x33c   : > { %2640 = vmatmul.mubr.bf16.vlgmr.msra.gmra.mrb[4].mxu0 %v6196_v24 }
 0x33d   : > { %3612 = vmatprep.mubr.bf16.mxu0 %v5523_v46  ;;  %v2015_v46 = vld [vmem:[%s6464_s27] sm:$0x3]  ;;  %3581 = vmatpush1.bf16.msra.mxu0 %v4966_v9  ;;  %v5031_v9 = vld [vmem:[#allocation20 + $0xd4] ss:$8 sps:$4 sm:$0xff]   ;;  %s3773_s27 = scalar_lea.sflag [#allocation4], %s6035_s4 }
 0x33e   : > { %v2255_v35 = vrot.slane %v2015_v46, %v6151_v2  ;;  %v2259_v37 = vrot.slane %v2015_v46, %v6146_v0  ;;  %3582 = vmatprep.subr.bf16.mxu0 %v4971_v11 }
 0x341   : > { %3583 = vmatpush1.bf16.msra.mxu0 %v4969_v12 }
 0x342   : > { %3584 = vmatprep.subr.bf16.mxu0 %v4974_v14 }
 0x345   : > { %3585 = vmatpush1.bf16.msra.mxu0 %v4972_v15 }
 0x346   : > { %3586 = vmatprep.subr.bf16.mxu0 %v4977_v21  ;;  %v5034_v21 = vld [vmem:[#allocation20 + $0xe4] ss:$8 sps:$4 sm:$0xff]  }
 0x349   : > { %3587 = vmatpush1.bf16.msra.mxu0 %v4975_v22  ;;  %v5032_v22 = vld [vmem:[#allocation20 + $0xe0] ss:$8 sps:$4 sm:$0xff]  }
 0x34a   : > { %3588 = vmatprep.subr.bf16.mxu0 %v4980_v23 }
 0x40f   : > { %v2641_v38 = vpop.f32.mrb[4].mxu0 }
 0x410   : > { %v4426_v39 = vadd.f32 %v2641_v38, %v2255_v35  ;;  %v2643_v40 = vpop.f32.mrb[5].mxu0 }
 0x411   : > { %v4427_v41 = vadd.f32 %v2643_v40, %v2259_v37  ;;  %v2645_v42 = vpop.f32.mrb[6].mxu0  ;;  %v4990_v40 = vld [vmem:[#allocation20] ss:$8 sps:$4 sm:$0xff]  }
 0x412   : > { %v2748_v43 = vadd.f32 %v4426_v39, %v2737_v25  ;;  %v4428_v47 = vadd.f32 %v2645_v42, %v2255_v35  ;;  %v2647_v48 = vpop.f32.mrb[7].mxu0  ;;  %v4978_v25 = vld [vmem:[%s6465_s21 + $0x40] ss:$8 sps:$4 sm:$0xff]  }
 0x413   : > { %v2749_v49 = vadd.f32 %v4427_v41, %v2739_v27  ;;  %v4429_v50 = vadd.f32 %v2647_v48, %v2259_v37  ;;  %3589 = vmatpush1.bf16.msra.mxu0 %v4978_v25  ;;  %v4981_v27 = vld [vmem:[%s6465_s21 + $0x50] ss:$8 sps:$4 sm:$0xff]  }
 0x414   : > { %v2750_v51 = vadd.f32 %v4428_v47, %v2743_v29  ;;  %v2752_v54 = vmax.f32 %v2748_v43, 0.0  ;;  %3590 = vmatprep.subr.bf16.mxu0 %v4983_v26  ;;  %v4984_v29 = vld [vmem:[%s6465_s21 + $0x60] ss:$8 sps:$4 sm:$0xff]   ;;  %v4996_v47 = vld [vmem:[#allocation20 + $0x20] ss:$8 sps:$4 sm:$0xff]  }
 0x415   : > { %v2751_v52 = vadd.f32 %v4429_v50, %v2745_v31  ;;  %v2753_v56 = vmax.f32 %v2749_v49, 0.0  ;;  %v4987_v31 = vld [vmem:[%s6465_s21 + $0x70] ss:$8 sps:$4 sm:$0xff]   ;;  %v4999_v49 = vld [vmem:[#allocation20 + $0x30] ss:$8 sps:$4 sm:$0xff]  }
 0x416   : > { %v2754_v55 = vmax.f32 %v2750_v51, 0.0  ;;  %v4992_v41 = vld [vmem:[#allocation20 + $0x4] ss:$8 sps:$4 sm:$0xff]   ;;  %v4995_v42 = vld [vmem:[#allocation20 + $0x14] ss:$8 sps:$4 sm:$0xff]  }
 0x417   : > { %v2755_v57 = vmax.f32 %v2751_v52, 0.0  ;;  %3591 = vmatpush1.bf16.msra.mxu0 %v4981_v27  ;;  %3161 = vmatprep.subr.bf16.mxu1 %v4992_v41  ;;  %v4998_v43 = vld [vmem:[#allocation20 + $0x24] ss:$8 sps:$4 sm:$0xff]   ;;  %v5001_v48 = vld [vmem:[#allocation20 + $0x34] ss:$8 sps:$4 sm:$0xff]  }
 0x418   : > { %v2756_v58 = vpack.c.bf16 %v2754_v55, %v2752_v54  ;;  %3592 = vmatprep.subr.bf16.mxu0 %v4986_v28  ;;  %v5004_v50 = vld [vmem:[#allocation20 + $0x44] ss:$8 sps:$4 sm:$0xff]   ;;  %v5002_v51 = vld [vmem:[#allocation20 + $0x40] ss:$8 sps:$4 sm:$0xff]   ;;  %v5007_v52 = vld [vmem:[#allocation20 + $0x54] ss:$8 sps:$4 sm:$0xff]  }
 0x419   : > { %v2757_v59 = vpack.c.bf16 %v2755_v57, %v2753_v56  ;;  %v5005_v54 = vld [vmem:[#allocation20 + $0x50] ss:$8 sps:$4 sm:$0xff]   ;;  %v5010_v55 = vld [vmem:[#allocation20 + $0x64] ss:$8 sps:$4 sm:$0xff]   ;;  %v5008_v56 = vld [vmem:[#allocation20 + $0x60] ss:$8 sps:$4 sm:$0xff]  }
 0x41a   : > { %v5013_v57 = vld [vmem:[#allocation20 + $0x74] ss:$8 sps:$4 sm:$0xff]   ;;  %v5035_v27 = vld [vmem:[#allocation20 + $0xf0] ss:$8 sps:$4 sm:$0xff]   ;;  %v5524_v28 = vmov 3  }
 0x41b   : > { %2925 = vmatprep.mubr.bf16.mxu1 %v2757_v59  ;;  %3593 = vmatpush1.bf16.msra.mxu0 %v4984_v29  ;;  %v5016_v59 = vld [vmem:[#allocation20 + $0x84] ss:$8 sps:$4 sm:$0xff]   ;;  %v5037_v26 = vld [vmem:[#allocation20 + $0xf4] ss:$8 sps:$4 sm:$0xff]  }
 0x41c   : > { %2926 = vmatmul.mubr.bf16.vlgmr.msra.gmra.mrb[8].mxu1 %v2756_v58  ;;  %3594 = vmatprep.subr.bf16.mxu0 %v4989_v30  ;;  %v5011_v58 = vld [vmem:[#allocation20 + $0x70] ss:$8 sps:$4 sm:$0xff]   ;;  %v5040_v29 = vld [vmem:[#allocation20 + $0x104] ss:$8 sps:$4 sm:$0xff]   ;;  %v5525_v30 = vmov 1  }
 0x41d   : > { %3162 = vmatpush1.bf16.msra.mxu1 %v4990_v40 }
 0x41e   : > { %3163 = vmatprep.subr.bf16.mxu1 %v4995_v42 }
 0x41f   : > { %3595 = vmatpush1.bf16.msra.mxu0 %v4987_v31 }
 0x422   : > { %3613 = vmatmul.mubr.bf16.vlgmr.msra.gmra.mrb[8].mxu0 %v6196_v24  ;;  %v4993_v24 = vld [vmem:[#allocation20 + $0x10] ss:$8 sps:$4 sm:$0xff]  }
 0x423   : > { %3164 = vmatpush1.bf16.msra.mxu1 %v4993_v24 }
 0x424   : > { %3165 = vmatprep.subr.bf16.mxu1 %v4998_v43  ;;  %v5038_v43 = vld [vmem:[#allocation20 + $0x100] ss:$8 sps:$4 sm:$0xff]  }
 0x427   : > { %3166 = vmatpush1.bf16.msra.mxu1 %v4996_v47  ;;  %v5043_v47 = vld [vmem:[#allocation20 + $0x114] ss:$8 sps:$4 sm:$0xff]  }
 0x428   : > { %3167 = vmatprep.subr.bf16.mxu1 %v5001_v48 }
 0x42b   : > { %3168 = vmatpush1.bf16.msra.mxu1 %v4999_v49  ;;  %v5041_v49 = vld [vmem:[#allocation20 + $0x110] ss:$8 sps:$4 sm:$0xff]  }
 0x42c   : > { %3169 = vmatprep.subr.bf16.mxu1 %v5004_v50  ;;  %v5046_v50 = vld [vmem:[#allocation20 + $0x124] ss:$8 sps:$4 sm:$0xff]  }
 0x42f   : > { %3170 = vmatpush1.bf16.msra.mxu1 %v5002_v51 }
 0x430   : > { %3171 = vmatprep.subr.bf16.mxu1 %v5007_v52  ;;  %v5049_v52 = vld [vmem:[#allocation20 + $0x134] ss:$8 sps:$4 sm:$0xff]  }
 0x433   : > { %3172 = vmatpush1.bf16.msra.mxu1 %v5005_v54  ;;  %v5047_v54 = vld [vmem:[#allocation20 + $0x130] ss:$8 sps:$4 sm:$0xff]  }
 0x434   : > { %3173 = vmatprep.subr.bf16.mxu1 %v5010_v55  ;;  %v5052_v55 = vld [vmem:[#allocation20 + $0x144] ss:$8 sps:$4 sm:$0xff]  }
 0x437   : > { %3174 = vmatpush1.bf16.msra.mxu1 %v5008_v56  ;;  %v5050_v56 = vld [vmem:[#allocation20 + $0x140] ss:$8 sps:$4 sm:$0xff]  }
 0x438   : > { %3175 = vmatprep.subr.bf16.mxu1 %v5013_v57  ;;  %v5055_v57 = vld [vmem:[#allocation20 + $0x154] ss:$8 sps:$4 sm:$0xff]  }
 0x43b   : > { %3176 = vmatpush1.bf16.msra.mxu1 %v5011_v58  ;;  %v5053_v58 = vld [vmem:[#allocation20 + $0x150] ss:$8 sps:$4 sm:$0xff]  }
 0x43c   : > { %3177 = vmatprep.subr.bf16.mxu1 %v5016_v59  ;;  %v5061_v59 = vld [vmem:[#allocation20 + $0x174] ss:$8 sps:$4 sm:$0xff]  }
 0x4ef   : > { %v4400_v60 = vpop.f32.mrb[8].mxu1 }
 0x4f0   : > { %v4401_v63 = vpop.f32.mrb[9].mxu1 }
 0x4f1   : > { %v4402_v4 = vadd.f32 %v4401_v63, %v4400_v60  ;;  %v4403_v6 = vpop.f32.mrb[10].mxu1  ;;  %v5014_v60 = vld [vmem:[#allocation20 + $0x80] ss:$8 sps:$4 sm:$0xff]   ;;  %v5019_v63 = vld [vmem:[#allocation20 + $0x94] ss:$8 sps:$4 sm:$0xff]  }
 0x4f2   : > { %v4404_v3 = vpop.f32.mrb[11].mxu1  ;;  %3178 = vmatpush1.bf16.msra.mxu1 %v5014_v60  ;;  %v5059_v60 = vld [vmem:[#allocation20 + $0x170] ss:$8 sps:$4 sm:$0xff]  }
 0x4f3   : > { %v4405_v5 = vadd.f32 %v4404_v3, %v4403_v6  ;;  %v2928_v7 = vadd.f32 %v4402_v4, %v4265_v1  ;;  %3179 = vmatprep.subr.bf16.mxu1 %v5019_v63  ;;  %v5022_v4 = vld [vmem:[#allocation20 + $0xa4] ss:$8 sps:$4 sm:$0xff]   ;;  %v5020_v6 = vld [vmem:[#allocation20 + $0xa0] ss:$8 sps:$4 sm:$0xff]   ;;  %v5025_v3 = vld [vmem:[#allocation20 + $0xb4] ss:$8 sps:$4 sm:$0xff]  }
 0x4f4   : > { %v5064_v63 = vld [vmem:[#allocation20 + $0x184] ss:$8 sps:$4 sm:$0xff]  }
 0x4f5   : > { %2934 = vmax.xlane.f32.xlu0 %v2928_v7  ;;  %v2931_v8 = vadd.f32 %v4405_v5, %v4265_v1  ;;  %v5017_v1 = vld [vmem:[#allocation20 + $0x90] ss:$8 sps:$4 sm:$0xff]   ;;  %v6262_v31 = vpop.f32.mrb[8].mxu0 }
 0x4f6   : > { %3180 = vmatpush1.bf16.msra.mxu1 %v5017_v1  ;;  %v5023_v5 = vld [vmem:[#allocation20 + $0xb0] ss:$8 sps:$4 sm:$0xff]   ;;  %v5062_v1 = vld [vmem:[#allocation20 + $0x180] ss:$8 sps:$4 sm:$0xff]  }
 0x4f7   : > { %3181 = vmatprep.subr.bf16.mxu1 %v5022_v4  ;;  %v5067_v4 = vld [vmem:[#allocation20 + $0x194] ss:$8 sps:$4 sm:$0xff]  }
 0x4f9   : > { %2936 = vmax.xlane.f32.xlu0 %v2931_v8 }
 0x4fa   : > { %3182 = vmatpush1.bf16.msra.mxu1 %v5020_v6  ;;  %v5065_v6 = vld [vmem:[#allocation20 + $0x190] ss:$8 sps:$4 sm:$0xff]  }
 0x4fb   : > { %3183 = vmatprep.subr.bf16.mxu1 %v5025_v3  ;;  %v5070_v3 = vld [vmem:[#allocation20 + $0x1a4] ss:$8 sps:$4 sm:$0xff]  }
 0x4fe   : > { %3184 = vmatpush1.bf16.msra.mxu1 %v5023_v5  ;;  %v5068_v5 = vld [vmem:[#allocation20 + $0x1a0] ss:$8 sps:$4 sm:$0xff]  }
 0x582   : > { %v2935_v32 = vpop.xlane.xlu0 %2934 }
 0x583   : > { %v2938_v33 = vsub.f32 %v2928_v7, %v2935_v32  ;;  %v5028_v7 = vld [vmem:[#allocation20 + $0xc4] ss:$8 sps:$4 sm:$0xff]   ;;  %v6264_v32 = vpop.f32.mrb[9].mxu0 }
 0x584   : > { %3185 = vmatprep.subr.bf16.mxu1 %v5028_v7  ;;  %v5073_v7 = vld [vmem:[#allocation20 + $0x1b4] ss:$8 sps:$4 sm:$0xff]  }
 0x585   : > { %v2940_v34 = vmul.f32 1.442695, %v2938_v33  ;;  %v5526_v33 = vmov 2  }
 0x586   : > { %v2937_v46 = vpop.xlane.xlu0 %2936 }
 0x587   : > { %5086 = vpow2.f32 %v2940_v34  ;;  %v2939_v35 = vsub.f32 %v2931_v8, %v2937_v46  ;;  %v5026_v8 = vld [vmem:[#allocation20 + $0xc0] ss:$8 sps:$4 sm:$0xff]   ;;  %v6266_v34 = vpop.f32.mrb[10].mxu0 }
 0x588   : > { %3186 = vmatpush1.bf16.msra.mxu1 %v5026_v8  ;;  %v6268_v46 = vpop.f32.mrb[11].mxu0  ;;  %v5071_v8 = vld [vmem:[#allocation20 + $0x1b0] ss:$8 sps:$4 sm:$0xff]  }
 0x589   : > { %v2942_v37 = vmul.f32 1.442695, %v2939_v35  ;;  %3187 = vmatprep.subr.bf16.mxu1 %v5031_v9  ;;  %v5076_v9 = vld [vmem:[#allocation20 + $0x1c4] ss:$8 sps:$4 sm:$0xff]  }
 0x58b   : > { %5088 = vpow2.f32 %v2942_v37 }
 0x58c   : > { %3188 = vmatpush1.bf16.msra.mxu1 %v5029_v10  ;;  %v5074_v10 = vld [vmem:[#allocation20 + $0x1c0] ss:$8 sps:$4 sm:$0xff]  }
 0x58d   : > { %3189 = vmatprep.subr.bf16.mxu1 %v5034_v21  ;;  %v5085_v21 = vld [vmem:[#allocation20 + $0x1f4] ss:$8 sps:$4 sm:$0xff]  }
 0x590   : > { %3190 = vmatpush1.bf16.msra.mxu1 %v5032_v22  ;;  %v3640_v22 = vld [vmem:[#allocation21 + $0x8] sm:$0xff] }
 0x591   : > { %v6254_v38 = vpop.eup %5086  ;;  %3191 = vmatprep.subr.bf16.mxu1 %v5037_v26 }
 0x592   : > { %2944 = vadd.xlane.f32.xlu1 %v6254_v38 }
 0x594   : > { %3192 = vmatpush1.bf16.msra.mxu1 %v5035_v27 }
 0x595   : > { %v6257_v39 = vpop.eup %5088  ;;  %3425 = vmatprep.subr.bf16.mxu1 %v5040_v29  ;;  %v3641_v29 = vld [vmem:[#allocation21 + $0x10] sm:$0x1] }
 0x596   : > { %2946 = vadd.xlane.f32.xlu1 %v6257_v39 }
 0x61f   : > { %v2945_v11 = vpop.xlane.xlu1 %2944 }
 0x620   : > { %5090 = vrcp.f32 %v2945_v11  ;;  %v5079_v11 = vld [vmem:[#allocation20 + $0x1d4] ss:$8 sps:$4 sm:$0xff]  }
 0x623   : > { %v2947_v12 = vpop.xlane.xlu1 %2946 }
 0x624   : > { %5092 = vrcp.f32 %v2947_v12  ;;  %v5077_v12 = vld [vmem:[#allocation20 + $0x1d0] ss:$8 sps:$4 sm:$0xff]  }
 0x62a   : > { %v5091_v14 = vpop.eup %5090 }
 0x62b   : > { %v2950_v15 = vmul.f32 %v5091_v14, %v6254_v38  ;;  %v5082_v14 = vld [vmem:[#allocation20 + $0x1e4] ss:$8 sps:$4 sm:$0xff]  }
 0x62d   : > { %2955 = vperm.xlu0 %4623, %v2950_v15  }
 0x62e   : > { %v5093_v23 = vpop.eup %5092 }
 0x62f   : > { %v2951_v25 = vmul.f32 %v5093_v23, %v6257_v39  ;;  %v3642_v23 = vld [vmem:[#allocation21 + $0x18] sm:$0x1] }
 0x630   : > { %v4412_v27 = vpack.c.bf16 %v3642_v23, %v3640_v22 }
 0x631   : > { %2960 = vperm.xlu1 %4624, %v2951_v25   ;;  %4630 = vset.pattern.permute.xlu0 %v5524_v28 }
 0x635   : > { %4625 = vset.pattern.permute.xlu1 %v5525_v30 }
 0x636   : > { %3220 = vperm.xlu1 %4625, %v2950_v15  }
 0x63a   : > { %3224 = vperm.xlu1 %4625, %v2951_v25  }
 0x63e   : > { %4626 = vset.pattern.permute.xlu1 %v5526_v33 }
 0x63f   : > { %3624 = vperm.xlu1 %4626, %v2950_v15  }
 0x643   : > { %4627 = vset.pattern.permute.xlu1 %v5524_v28 }
 0x644   : > { %3739 = vperm.xlu1 %4627, %v2950_v15   ;;  %v5080_v15 = vld [vmem:[#allocation20 + $0x1e0] ss:$8 sps:$4 sm:$0xff]  }
 0x648   : > { %4628 = vset.pattern.permute.xlu1 %v5526_v33 }
 0x649   : > { %3628 = vperm.xlu1 %4628, %v2951_v25  }
 0x64d   : > { %4629 = vset.pattern.permute.xlu1 %v5524_v28  ;;  %v3639_v28 = vld [vmem:[#allocation21] sm:$0xff] }
 0x64e   : > { %3743 = vperm.xlu1 %4629, %v2951_v25   ;;  %v5083_v25 = vld [vmem:[#allocation20 + $0x1f0] ss:$8 sps:$4 sm:$0xff]   ;;  %v4415_v33 = vpack.c.bf16 %v3641_v29, %v3639_v28 }
 0x6ac   : > { %v2956_v35 = vpop.permute.xlu0 %2955 }
 0x6ad   : > { %v2963_v38 = vmul.f32 %v6174_v19, %v2956_v35  ;;  %v2964_v39 = vmul.f32 %v6168_v16, %v2956_v35 }
 0x6b0   : > { %v2961_v37 = vpop.permute.xlu1 %2960 }
 0x6b1   : > { %v2965_v40 = vmul.f32 %v6166_v13, %v2961_v37  ;;  %v2966_v41 = vmul.f32 %v6170_v17, %v2961_v37  ;;  %v5044_v17 = vld [vmem:[#allocation20 + $0x120] ss:$8 sps:$4 sm:$0xff]  }
 0x6b3   : > { %v2967_v42 = vpack.c.bf16 %v2965_v40, %v2963_v38  ;;  %v2968_v24 = vpack.c.bf16 %v2966_v41, %v2964_v39  ;;  %v2952_v39 = vld [vmem:[%s6467_s5] sm:$0x3] }
 0x6b4   : > { %v3212_v40 = vrot.slane %v2952_v39, %v6146_v0 }
 0x6b5   : > { %v6274_v48 = vpop.permute.xlu1 %3220  ;;  %3193 = vmatprep.mubr.bf16.mxu1 %v2968_v24 }
 0x6b6   : > { %3194 = vmatmul.mubr.bf16.vlgmr.msra.gmra.mrb[12].mxu1 %v2967_v42  ;;  %v3228_v16 = vmul.f32 %v6176_v20, %v6274_v48  ;;  %v5058_v20 = vld [vmem:[#allocation20 + $0x164] ss:$8 sps:$4 sm:$0xff]   ;;  %v3227_v30 = vmul.f32 %v6187_v61, %v6274_v48 }
 0x6b7   : > { %3426 = vmatpush1.bf16.msra.mxu1 %v5038_v43 }
 0x6b8   : > { %3427 = vmatprep.subr.bf16.mxu1 %v5043_v47 }
 0x6b9   : > { %v3225_v51 = vpop.permute.xlu1 %3224 }
 0x6ba   : > { %v3230_v13 = vmul.f32 %v6172_v18, %v3225_v51  ;;  %v5056_v18 = vld [vmem:[#allocation20 + $0x160] ss:$8 sps:$4 sm:$0xff]   ;;  %v3229_v26 = vmul.f32 %v6190_v62, %v3225_v51  ;;  %v3488_v62 = vld [vmem:[%s6466_s19] sm:$0x3]  ;;  %s5402_s19 = scalar_lea.vmem %s6318_s6, 256 }
 0x6bb   : > { %3428 = vmatpush1.bf16.msra.mxu1 %v5041_v49  ;;  %v3493_v37 = vrot.slane %v3488_v62, %v6151_v2  ;;  %v3497_v36 = vrot.slane %v3488_v62, %v6146_v0  ;;  %p5403_p8 = scmp.ne.s32.totalorder %s6318_s6, %s5402_s19  ;;  %p5410_p1 = scmp.lt.s32.totalorder %s5408_s3, %s5402_s19 }
 0x6bc   : > { %v3232_v19 = vpack.c.bf16 %v3230_v13, %v3228_v16  ;;  %3429 = vmatprep.subr.bf16.mxu1 %v5046_v50  ;;  %v3231_v35 = vpack.c.bf16 %v3229_v26, %v3227_v30 }
 0x6bd   : > { %v3619_v41 = vadd.f32 %v6266_v34, %v3493_v37  ;;  %v3621_v42 = vadd.f32 %v6268_v46, %v3497_v36  ;;  %p5404_p0 = pnand %p5403_p8, %p6471_p4  ;;  %p5411_p2 = por %p5410_p1, %p5409_p10 }
 0x6be   : > { %3457 = vmatprep.mubr.bf16.mxu1 %v3232_v19  ;;  %v3625_v61 = vpop.permute.xlu1 %3624 }
 0x6bf   : > { %3430 = vmatpush1.bf16.msra.mxu1 %v5044_v17  ;;  %p5405_p9 = pneg %p5404_p0 }
 0x6c0   : > { %3431 = vmatprep.subr.bf16.mxu1 %v5049_v52 }
 0x6c1   : > { %p5412_p5 = pnand %p5411_p2, %p5405_p9 }
 0x6c3   : > { %3432 = vmatpush1.bf16.msra.mxu1 %v5047_v54  ;;  %v3740_v38 = vpop.permute.xlu1 %3739 }
 0x6c4   : > { %3433 = vmatprep.subr.bf16.mxu1 %v5052_v55 }
 0x6c7   : > { %3434 = vmatpush1.bf16.msra.mxu1 %v5050_v56 }
 0x6c8   : > { %3435 = vmatprep.subr.bf16.mxu1 %v5055_v57  ;;  %v3629_v24 = vpop.permute.xlu1 %3628 }
 0x6c9   : > { %v3633_v13 = vmul.f32 %v3629_v24, %v3619_v41  ;;  %v3634_v52 = vmul.f32 %v3629_v24, %v3621_v42 }
 0x6cb   : > { %3436 = vmatpush1.bf16.msra.mxu1 %v5053_v58 }
 0x6cc   : > { %3437 = vmatprep.subr.bf16.mxu1 %v5058_v20 }
 0x6cf   : > { %3438 = vmatpush1.bf16.msra.mxu1 %v5056_v18 }
 0x6d0   : > { %3439 = vmatprep.subr.bf16.mxu1 %v5061_v59 }
 0x6d3   : > { %3440 = vmatpush1.bf16.msra.mxu1 %v5059_v60 }
 0x6d4   : > { %3441 = vmatprep.subr.bf16.mxu1 %v5064_v63 }
 0x6d7   : > { %3442 = vmatpush1.bf16.msra.mxu1 %v5062_v1 }
 0x6d8   : > { %3443 = vmatprep.subr.bf16.mxu1 %v5067_v4 }
 0x6db   : > { %3444 = vmatpush1.bf16.msra.mxu1 %v5065_v6 }
 0x6dc   : > { %3445 = vmatprep.subr.bf16.mxu1 %v5070_v3 }
 0x6df   : > { %3446 = vmatpush1.bf16.msra.mxu1 %v5068_v5  ;;  %v3744_v5 = vpop.permute.xlu1 %3743 }
 0x6e0   : > { %3447 = vmatprep.subr.bf16.mxu1 %v5073_v7 }
 0x6e3   : > { %3448 = vmatpush1.bf16.msra.mxu1 %v5071_v8 }
 0x6e4   : > { %3449 = vmatprep.subr.bf16.mxu1 %v5076_v9 }
 0x6e7   : > { %3450 = vmatpush1.bf16.msra.mxu1 %v5074_v10 }
 0x6e8   : > { %3451 = vmatprep.subr.bf16.mxu1 %v5079_v11 }
 0x6eb   : > { %3452 = vmatpush1.bf16.msra.mxu1 %v5077_v12 }
 0x6ec   : > { %3453 = vmatprep.subr.bf16.mxu1 %v5082_v14 }
 0x6ef   : > { %3454 = vmatpush1.bf16.msra.mxu1 %v5080_v15 }
 0x6f0   : > { %3455 = vmatprep.subr.bf16.mxu1 %v5085_v21 }
 0x6f3   : > { %3456 = vmatpush1.bf16.msra.mxu1 %v5083_v25 }
 0x6f4   : > { %4414 = vmatprep.subr.msk.bf16.mxu1 %vm6118_vm2, %v4412_v27 }
 0x6f6   : > { %3458 = vmatmul.mubr.bf16.vlgmr.msra.gmra.mrb[12].mxu1 %v3231_v35 }
 0x6f7   : > { %4417 = vmatpush1.bf16.msk.msra.mxu1 %vm6118_vm2, %v4415_v33  ;;  %3725 = vmatprep.mubr.f32.mxu1 %v5522_v45 }
 0x6fe   : > { %4364 = vmatmul.mubr.msk.f32.vlgmr.msra.gmra.mrb[16].mxu1 %vm1020_vm3, %v6130_v44  ;;  %v3615_v44 = vadd.f32 %v6262_v31, %v3493_v37  ;;  %v3643_v31 = vld [vmem:[%s6468_s1] sm:$0x3] }
 0x6ff   : > { %3731 = vmatprep.mubr.f32.mxu1 %v5522_v45  ;;  %v3208_v45 = vrot.slane %v2952_v39, %v6151_v2  ;;  %v3648_v55 = vrot.slane %v3643_v31, %v6151_v2  ;;  %v3652_v57 = vrot.slane %v3643_v31, %v6146_v0 }
 0x700   : > { %v3631_v47 = vmul.f32 %v3625_v61, %v3615_v44 }
 0x702   : > { %4365 = vmatmul.mubr.msk.f32.gmra.mrb[18].mxu1 %vm1020_vm3, %v6142_v53  ;;  %v3617_v53 = vadd.f32 %v6264_v32, %v3497_v36 }
 0x704   : > { %v3632_v50 = vmul.f32 %v3625_v61, %v3617_v53 }
 0x7c9   : > { %v3459_v43 = vpop.f32.mrb[12].mxu1 }
 0x7ca   : > { %v4430_v48 = vadd.f32 %v3459_v43, %v3208_v45  ;;  %v3461_v49 = vpop.f32.mrb[13].mxu1 }
 0x7cb   : > { %v4431_v51 = vadd.f32 %v3461_v49, %v3212_v40  ;;  %v3463_v16 = vpop.f32.mrb[14].mxu1 }
 0x7cc   : > { %v3635_v32 = vadd.f32 %v4430_v48, %v3631_v47  ;;  %v4432_v17 = vadd.f32 %v3463_v16, %v3208_v45  ;;  %v3465_v19 = vpop.f32.mrb[15].mxu1 }
 0x7cd   : > { %v3636_v34 = vadd.f32 %v4431_v51, %v3632_v50  ;;  %v4433_v54 = vadd.f32 %v3465_v19, %v3212_v40 }
 0x7ce   : > { %v3637_v46 = vadd.f32 %v4432_v17, %v3633_v13 }
 0x7cf   : > { %v3638_v56 = vadd.f32 %v4433_v54, %v3634_v52 }
 0x7d1   : > { %v3727_v58 = vpop.f32.mrb[16].mxu1 }
 0x7d2   : > { %v3728_v20 = vadd.f32 %v3727_v58, %v3648_v55  ;;  %v3729_v18 = vpop.f32.mrb[17].mxu1 }
 0x7d3   : > { %v3730_v59 = vadd.f32 %v3729_v18, %v3652_v57 }
 0x7d4   : > { %v3746_v60 = vmul.f32 %v3740_v38, %v3728_v20 }
 0x7d5   : > { %v3747_v63 = vmul.f32 %v3740_v38, %v3730_v59  ;;  %v3733_v1 = vpop.f32.mrb[18].mxu1 }
 0x7d6   : > { %v3750_v4 = vadd.f32 %v3746_v60, %v3635_v32  ;;  %v3734_v6 = vadd.f32 %v3733_v1, %v3648_v55  ;;  %v3735_v3 = vpop.f32.mrb[19].mxu1 }
 0x7d7   : > { %v3751_v7 = vadd.f32 %v3747_v63, %v3636_v34  ;;  %v3736_v8 = vadd.f32 %v3735_v3, %v3652_v57 }
 0x7d8   : > { %v3754_v9 = vmax.f32 %v3750_v4, 0.0  ;;  %v3748_v2 = vmul.f32 %v3744_v5, %v3734_v6 }
 0x7d9   : > { %v3755_v10 = vmax.f32 %v3751_v7, 0.0  ;;  %v3749_v0 = vmul.f32 %v3744_v5, %v3736_v8 }
 0x7da   : > { %v3752_v11 = vadd.f32 %v3748_v2, %v3637_v46 }
 0x7db   : > { %v4380_v12 = vpack.c.bf16 %v3755_v10, %v3754_v9  ;;  %v3753_v14 = vadd.f32 %v3749_v0, %v3638_v56 }
 0x7dc   : > { %v3756_v15 = vmax.f32 %v3752_v11, 0.0 }
 0x7dd   : > { %3770 = vst [vmem:[%s947_s20] sm:$0xff] %v4380_v12  ;;  %v3757_v21 = vmax.f32 %v3753_v14, 0.0 }
 0x7df   : > { %v4381_v22 = vpack.c.bf16 %v3757_v21, %v3756_v15 }
 0x7e1   : > { %3771 = vst [vmem:[%s947_s20 + $0x8] sm:$0xff] %v4381_v22 }
 0x7e2   : > { %5415 = shalt.err (!%p5412_p5)
}
 0x7e3   : > { %s5416_s5 = scalar_lea.hbm %s6316_s7, 256  ;;  %s5420_s1 = scalar_lea.hbm %s6470_s15, 512 }
 0x7e4   : > { %p5417_p11 = scmp.ne.s32.totalorder %s6316_s7, %s5416_s5  ;;  %p5421_p13 = scmp.lt.u32.totalorder %s6316_s7, %s6470_s15 }
 0x7e5   : > { %p5422_p7 = scmp.lt.u32.totalorder %s5420_s1, %s5416_s5  ;;  %p5424_p0 = scmp.lt.u32.totalorder %s5416_s5, %s6316_s7 }
 0x7e6   : > { %p5418_p12 = pnand %p5417_p11, %p6471_p4 }
 0x7e7   : > { %p5423_p8 = por %p5422_p7, %p5421_p13 }
 0x7e8   : > { %p5419_p6 = pneg %p5418_p12 }
 0x7e9   : > { %p5425_p9 = por %p5424_p0, %p5423_p8 }
 0x7eb   : > { %p5426_p10 = pnand %p5425_p9, %p5419_p6 }
 0x7ed   : > { %5429 = shalt.err (!%p5426_p10)
}
 0x7ee   : > { %s5528_s20 = smov 128   ;;  %s5529_s18 = smov 8  }
 0x7ef   : > { %4505 = dma.vmem_to_hbm [thread:$0]  (%p6471_p4), %s6318_s6, 256, %s6316_s7, %s3773_s27, %s5528_s20, %s5528_s20, %s5529_s18  }
 0x7f0 PF: > { %s6472_s16 = sld [smem:[#allocation35_spill]]  ;;  %s6473_s19 = sld [smem:[#allocation39_spill]] }
 0x7f6   : > { %s3802_s2 = sand.u32 1, %s6472_s16   ;;  %p6474_p1 = scmp.ne.s32.totalorder %s6473_s19, 0 }
 0x7f7   : > { %s3803_s26 = scalar_lea.sflag [#allocation4], %s3802_s2 }
 0x7f8   : > { %p4536_p2 = pnand %p4018_p3, %p6474_p1 }
 0x7fa   : > { %5475 = dma.done.wait (!%p4536_p2), %s3803_s26, 256  }
 0x7fb   : > { %5477 = vsyncadd (!%p4536_p2), %s3803_s26, 4294967040  ;;  %s6475_s24 = sld [smem:[#allocation36_spill]]  ;;  %s6476_s3 = sld [smem:[#allocation37_spill]] }
 0x7fc   : > { %s6477_s1 = smov %s5484_s22  ;;  %s6478_s22 = smov %s5488_s23 }
 0x801   : > { %p41_p5 = scmp.ge.s32.totalorder %s6475_s24, 4   ;;  %s6479_s23 = smov %s6476_s3 }
 0x803   :  { %43 = sbr.rel (!%p41_p5) target bundleno = 28 (0x1c), region = 256 }
 0x80a   :  { %3808 = vsyncpa [#allocation3], 1 }
 0x80b   :  { %3810 = vsyncpa [#allocation3 + $0x1], 1 }
 0x80c   :  { %3811 = vsyncpa [#allocation6], 1 }
 0x80d   :  { %3813 = vsyncpa [#allocation6 + $0x1], 1 }
 0x80e   :  { %3814 = vsyncpa [#allocation10], 1 }
 0x80f   :  { %3815 = vsyncpa [#allocation13], 1 }
 0x810   :  { %3816 = vsyncpa [#allocation16], 1 }
 0x811   :  { %3817 = vsyncpa [#allocation19], 1 }
 0x812   :  { %3818 = vsyncpa [#allocation22], 1 }
 0x813   :  { %3819 = vsyncpa [#allocation4], 1 }
 0x814   :  { %3821 = vsyncpa [#allocation4 + $0x1], 1 }

</bundles_post_ra>
